<compile_context>
chip_gen: v7x
topology: tpu7x:2x2x1
jax: 0.10.0
libtpu: 0.0.40
codegen_flags: <defaults>
</compile_context>

<pallas_src>
import functools

import jax
import jax.numpy as jnp
from jax.experimental import pallas as pl
from jax.experimental.pallas import tpu as pltpu


def _round_up(x, m):
    return ((x + m - 1) // m) * m


def fold_bn(gamma, beta, mean, var, eps=1e-5):
    scale = gamma / jnp.sqrt(var + eps)
    return scale, beta - mean * scale


def _folded_weights(params):
    """Fold eval-mode BN scale into conv weights, cast to bf16 (MXU operands)."""
    s1, b1 = fold_bn(params["g1"], params["be1"], params["m1"], params["v1"])
    s2, b2 = fold_bn(params["g2"], params["be2"], params["m2"], params["v2"])
    fw = {
        "w1": (params["w1"] * s1[:, None, None, None]).astype(jnp.bfloat16),
        "b1": b1.astype(jnp.float32),
        "w2": (params["w2"] * s2[:, None, None, None]).astype(jnp.bfloat16),
        "b2": b2.astype(jnp.float32),
    }
    if "w_sc" in params:
        ss, bs = fold_bn(params["g_sc"], params["be_sc"],
                         params["m_sc"], params["v_sc"])
        fw["w_sc"] = (params["w_sc"] * ss[:, None, None, None]).astype(jnp.bfloat16)
        fw["b_sc"] = bs.astype(jnp.float32)
    return fw


# -----------------------------------------------------------------------------
# Fused BasicBlock kernel (one image per grid step).
#
# Flat "row-padded" layout: the padded image (H+2 rows x Wp cols, Wp = W+2) is
# flattened so pixel (h, w) of the unpadded image sits at flat index
# (h+1)*Wp + (w+1).  Output index p = h*Wp + w.  Then the input element needed
# by output p for conv tap (dy, dx) is at flat index p + dy*Wp + dx — a
# CONSTANT offset, so every tap is one contiguous lane-dense window and the
# 3x3 conv is 9 accumulating MXU dots.  Columns w in {W, W+1} of the output are
# dead (garbage) and are (a) zeroed by `mask` before feeding conv2 and
# (b) sliced away by the wrapper.
# -----------------------------------------------------------------------------
def _basic_block_kernel(H, W, Cin, Cout, woff, has_projection, *refs):
    Wp = W + 2
    HWp = H * Wp
    f32 = jnp.float32

    if has_projection:
        (x_ref, w1_ref, b1_ref, w2_ref, b2_ref, mask_ref, wsc_ref, bsc_ref,
         out_ref, h_ref) = refs
    else:
        (x_ref, w1_ref, b1_ref, w2_ref, b2_ref, mask_ref,
         out_ref, h_ref) = refs
        wsc_ref = bsc_ref = None

    # ---- conv1 (BN1 scale folded into w1): 9 accumulating bf16 MXU dots ------
    acc = jnp.zeros((Cout, HWp), f32)
    for tap in range(9):
        dy, dx = divmod(tap, 3)
        a = dy * Wp + dx
        win = x_ref[:, a:a + HWp]                       # (Cin, HWp) bf16
        acc = acc + jnp.dot(w1_ref[tap], win, preferred_element_type=f32)
    # BN1 bias + ReLU; kill the two dead pad columns of every row so conv2's
    # horizontal taps read true zeros at the W boundary.
    h = jnp.maximum(acc + b1_ref[...], 0.0) * mask_ref[...]

    # ---- re-embed h into a zero-margined flat slab for conv2 -----------------
    # Unconditional every step -> no cross-step scratch state (core-safe on
    # v7x); interior store starts at a 128-aligned lane offset.
    L2 = h_ref.shape[1]
    h_ref[:, 0:woff] = jnp.zeros((Cout, woff), h_ref.dtype)
    h_ref[:, woff + HWp:L2] = jnp.zeros((Cout, L2 - woff - HWp), h_ref.dtype)
    h_ref[:, woff:woff + HWp] = h.astype(h_ref.dtype)

    # ---- conv2 (BN2 scale folded into w2) -------------------------------------
    acc2 = jnp.zeros((Cout, HWp), f32)
    base = woff - (Wp + 1)                              # >= 0 by construction
    for tap in range(9):
        dy, dx = divmod(tap, 3)
        a = base + dy * Wp + dx
        win = h_ref[:, a:a + HWp]                       # (Cout, HWp) bf16
        acc2 = acc2 + jnp.dot(w2_ref[tap], win, preferred_element_type=f32)
    y = acc2 + b2_ref[...]

    # ---- shortcut (stays in VMEM / vregs, never round-trips through HBM) -----
    xc = x_ref[:, Wp + 1:Wp + 1 + HWp]                  # center window = x itself
    if has_projection:
        sc = jnp.dot(wsc_ref[...], xc, preferred_element_type=f32) + bsc_ref[...]
    else:
        sc = xc.astype(f32)                             # identity (Cin == Cout)

    # Residual add + ReLU; full-block lane-dense store.
    out_ref[...] = jnp.maximum(y + sc, 0.0).astype(out_ref.dtype)


# -----------------------------------------------------------------------------
# Wrapper
# -----------------------------------------------------------------------------
@jax.jit
def basic_block_forward(x_nchw, params):
    N, Cin, H, W = x_nchw.shape
    Cout = params["w1"].shape[0]
    has_projection = "w_sc" in params
    Wp = W + 2
    HWp = H * Wp

    fw = _folded_weights(params)
    # (tap, Cout, Cin) per-tap weight slices, tap = dy*3 + dx.
    w1 = jnp.transpose(fw["w1"], (2, 3, 0, 1)).reshape(9, Cout, Cin)
    w2 = jnp.transpose(fw["w2"], (2, 3, 0, 1)).reshape(9, Cout, Cout)
    b1 = fw["b1"].reshape(Cout, 1)
    b2 = fw["b2"].reshape(Cout, 1)

    # Zero-padded, flattened, lane-dense input (N, Cin, Lx); x[h, w] sits at
    # flat index (h+1)*Wp + (w+1).  Pure XLA pad/reshape, stays channels-first.
    Lx = _round_up((H + 2) * Wp + 2, 128)
    xp = jnp.pad(x_nchw, ((0, 0), (0, 0), (1, 1), (1, 1)))
    xp = xp.reshape(N, Cin, (H + 2) * Wp)
    xp = jnp.pad(xp, ((0, 0), (0, 0), (0, Lx - (H + 2) * Wp)))
    xp = xp.astype(jnp.bfloat16)

    # {0,1} mask killing the two dead pad columns of each output row.
    mask = ((jnp.arange(HWp) % Wp) < W).astype(jnp.bfloat16).reshape(1, HWp)

    woff = _round_up(Wp + 1, 128)                 # aligned interior offset
    L2 = _round_up(woff + (H + 1) * Wp + 2, 128)  # conv2 slab length

    in_specs = [
        pl.BlockSpec((None, Cin, Lx), lambda n: (n, 0, 0)),   # x (lane-dense)
        pl.BlockSpec((9, Cout, Cin), lambda n: (0, 0, 0)),    # w1 taps
        pl.BlockSpec((Cout, 1), lambda n: (0, 0)),            # b1
        pl.BlockSpec((9, Cout, Cout), lambda n: (0, 0, 0)),   # w2 taps
        pl.BlockSpec((Cout, 1), lambda n: (0, 0)),            # b2
        pl.BlockSpec((1, HWp), lambda n: (0, 0)),             # pad-column mask
    ]
    args = [xp, w1, b1, w2, b2, mask]

    if has_projection:
        wsc = fw["w_sc"][:, :, 0, 0]                          # (Cout, Cin) bf16
        bsc = fw["b_sc"].reshape(Cout, 1)
        in_specs += [pl.BlockSpec((Cout, Cin), lambda n: (0, 0)),
                     pl.BlockSpec((Cout, 1), lambda n: (0, 0))]
        args += [wsc, bsc]

    flops = 2 * N * H * W * Cout * (9 * Cin + 9 * Cout
                                    + (Cin if has_projection else 0))
    bytes_accessed = (xp.size * 2 + N * Cout * HWp * 4
                      + w1.size * 2 + w2.size * 2
                      + (Cout * Cin * 2 if has_projection else 0))

    kernel = functools.partial(_basic_block_kernel, H, W, Cin, Cout, woff,
                               has_projection)
    out = pl.pallas_call(
        kernel,
        out_shape=jax.ShapeDtypeStruct((N, Cout, HWp), jnp.float32),
        grid=(N,),
        in_specs=in_specs,
        out_specs=pl.BlockSpec((None, Cout, HWp), lambda n: (n, 0, 0)),
        scratch_shapes=[pltpu.VMEM((Cout, L2), jnp.bfloat16)],  # conv2 input slab
        compiler_params=pltpu.CompilerParams(
            dimension_semantics=("parallel",),
            vmem_limit_bytes=32 * 1024 * 1024),
        cost_estimate=pl.CostEstimate(flops=flops, transcendentals=0,
                                      bytes_accessed=bytes_accessed),
    )(*args)

    # Drop the two dead pad columns; result is already NCHW.
    return out.reshape(N, Cout, H, Wp)[:, :, :, :W]


# -----------------------------------------------------------------------------
# Parameter init (mirrors nn.Conv2d(bias=False) + eval-mode nn.BatchNorm2d)
# -----------------------------------------------------------------------------
def init_basic_block_params(key, in_channels, out_channels):
    ks = jax.random.split(key, 6)

    def bn_params(k, c):
        k0, k1, k2, k3 = jax.random.split(k, 4)
        return (0.5 + jax.random.uniform(k0, (c,), jnp.float32),    # gamma
                0.1 * jax.random.normal(k1, (c,), jnp.float32),     # beta
                0.1 * jax.random.normal(k2, (c,), jnp.float32),     # running mean
                0.5 + jax.random.uniform(k3, (c,), jnp.float32))    # running var

    p = {}
    p["w1"] = 0.2 * jax.random.normal(
        ks[0], (out_channels, in_channels, 3, 3), jnp.float32)      # OIHW
    p["g1"], p["be1"], p["m1"], p["v1"] = bn_params(ks[1], out_channels)
    p["w2"] = 0.2 * jax.random.normal(
        ks[2], (out_channels, out_channels, 3, 3), jnp.float32)
    p["g2"], p["be2"], p["m2"], p["v2"] = bn_params(ks[3], out_channels)
    if in_channels != out_channels:
        p["w_sc"] = 0.2 * jax.random.normal(
            ks[4], (out_channels, in_channels, 1, 1), jnp.float32)
        p["g_sc"], p["be_sc"], p["m_sc"], p["v_sc"] = bn_params(ks[5], out_channels)
    return p


# -----------------------------------------------------------------------------
# References for verification
# -----------------------------------------------------------------------------
def _conv_nchw(x, w):
    pad = ((1, 1), (1, 1)) if w.shape[2] == 3 else ((0, 0), (0, 0))
    return jax.lax.conv_general_dilated(
        x, w, window_strides=(1, 1), padding=pad,
        dimension_numbers=("NCHW", "OIHW", "NCHW"),
        preferred_element_type=jnp.float32)


def basic_block_matched_reference(x, params):
    """Same bf16 folded weights / bf16 activations as the kernel (tight check)."""
    fw = _folded_weights(params)
    xb = x.astype(jnp.bfloat16)
    h = _conv_nchw(xb, fw["w1"]) + fw["b1"][None, :, None, None]
    hb = jnp.maximum(h, 0.0).astype(jnp.bfloat16)
    y = _conv_nchw(hb, fw["w2"]) + fw["b2"][None, :, None, None]
    if "w_sc" in params:
        sc = _conv_nchw(xb, fw["w_sc"]) + fw["b_sc"][None, :, None, None]
    else:
        sc = xb.astype(jnp.float32)
    return jnp.maximum(y + sc, 0.0)


def basic_block_f32_reference(x, params):
    """Full-f32 eval-mode module semantics (loose end-to-end check)."""
    def bn(y, g, be, m, v):
        s = g / jnp.sqrt(v + 1e-5)
        return y * s[None, :, None, None] + (be - m * s)[None, :, None, None]

    h = jnp.maximum(
        bn(_conv_nchw(x, params["w1"]),
           params["g1"], params["be1"], params["m1"], params["v1"]), 0.0)
    y = bn(_conv_nchw(h, params["w2"]),
           params["g2"], params["be2"], params["m2"], params["v2"])
    if "w_sc" in params:
        sc = bn(_conv_nchw(x, params["w_sc"]),
                params["g_sc"], params["be_sc"], params["m_sc"], params["v_sc"])
    else:
        sc = x
    return jnp.maximum(y + sc, 0.0)


if __name__ == "__main__":
    key = jax.random.PRNGKey(0)
    k_x, k_p, k_p2 = jax.random.split(key, 3)

    N, Cin, Cout, H, W = 2, 4, 8, 16, 16
    x = jax.random.normal(k_x, (N, Cin, H, W), jnp.float32)       # NCHW
    params = init_basic_block_params(k_p, Cin, Cout)              # projection path

    y = basic_block_forward(x, params)
    jax.block_until_ready(y)
    assert y.shape == (N, Cout, H, W)

    # Tight structural check (same bf16 operands, f32 accumulation).
    y_m = basic_block_matched_reference(x, params)
    assert jnp.allclose(y, y_m, atol=2e-2, rtol=2e-2), (
        float(jnp.max(jnp.abs(y - y_m))))

    # Loose end-to-end check vs. full-f32 module semantics (bf16 MXU operands).
    y_f = basic_block_f32_reference(x, params)
    rel = jnp.linalg.norm(y - y_f) / jnp.linalg.norm(y_f)
    assert rel < 0.08, float(rel)

    # Identity-shortcut variant (in_channels == out_channels).
    params_id = init_basic_block_params(k_p2, Cout, Cout)
    x2 = jax.random.normal(k_x, (N, Cout, H, W), jnp.float32)
    y2 = basic_block_forward(x2, params_id)
    jax.block_until_ready(y2)
    y2_m = basic_block_matched_reference(x2, params_id)
    assert jnp.allclose(y2, y2_m, atol=2e-2, rtol=2e-2), (
        float(jnp.max(jnp.abs(y2 - y2_m))))

    print("KERNEL_OK")
</pallas_src>

<mosaic_0001>
module attributes {stable_mosaic.version = 11 : i64} {
  func.func @_basic_block_kernel(%arg0: i32, %arg1: memref<1x4x384xbf16, #tpu.memory_space<vmem>>, %arg2: memref<9x8x4xbf16, #tpu.memory_space<vmem>>, %arg3: memref<8x1xf32, #tpu.memory_space<vmem>>, %arg4: memref<9x8x8xbf16, #tpu.memory_space<vmem>>, %arg5: memref<8x1xf32, #tpu.memory_space<vmem>>, %arg6: memref<1x288xbf16, #tpu.memory_space<vmem>>, %arg7: memref<8x4xbf16, #tpu.memory_space<vmem>>, %arg8: memref<8x1xf32, #tpu.memory_space<vmem>>, %arg9: memref<1x8x288xf32, #tpu.memory_space<vmem>>, %arg10: memref<8x512xbf16, #tpu.memory_space<vmem>>) attributes {dimension_semantics = [#tpu.dimension_semantics<parallel>], iteration_bounds = array<i64: 2>, scalar_prefetch = 0 : i64, scratch_operands = 1 : i64, tpu.core_type = #tpu.core_type<tc>, window_params = [{transform_indices = @transform_0, window_bounds = array<i64: 1, 4, 384>}, {pipeline_mode = #tpu.pipeline_mode<synchronous>, transform_indices = @transform_1, window_bounds = array<i64: 9, 8, 4>}, {pipeline_mode = #tpu.pipeline_mode<synchronous>, transform_indices = @transform_2, window_bounds = array<i64: 8, 1>}, {pipeline_mode = #tpu.pipeline_mode<synchronous>, transform_indices = @transform_3, window_bounds = array<i64: 9, 8, 8>}, {pipeline_mode = #tpu.pipeline_mode<synchronous>, transform_indices = @transform_4, window_bounds = array<i64: 8, 1>}, {pipeline_mode = #tpu.pipeline_mode<synchronous>, transform_indices = @transform_5, window_bounds = array<i64: 1, 288>}, {pipeline_mode = #tpu.pipeline_mode<synchronous>, transform_indices = @transform_6, window_bounds = array<i64: 8, 4>}, {pipeline_mode = #tpu.pipeline_mode<synchronous>, transform_indices = @transform_7, window_bounds = array<i64: 8, 1>}, {transform_indices = @transform_8, window_bounds = array<i64: 1, 8, 288>}]} {
    %cst = arith.constant 0.000000e+00 : f32
    %0 = vector.broadcast %cst : f32 to vector<8x288xf32>
    %c0 = arith.constant 0 : index
    %c0_0 = arith.constant 0 : index
    %c0_1 = arith.constant 0 : index
    %1 = vector.load %arg1[%c0, %c0_0, %c0_1] : memref<1x4x384xbf16, #tpu.memory_space<vmem>>, vector<1x4x288xbf16>
    %2 = vector.shape_cast %1 : vector<1x4x288xbf16> to vector<4x288xbf16>
    %c0_2 = arith.constant 0 : index
    %c0_3 = arith.constant 0 : index
    %c0_4 = arith.constant 0 : index
    %3 = vector.load %arg2[%c0_2, %c0_3, %c0_4] : memref<9x8x4xbf16, #tpu.memory_space<vmem>>, vector<1x8x4xbf16>
    %4 = vector.shape_cast %3 : vector<1x8x4xbf16> to vector<8x4xbf16>
    %cst_5 = arith.constant dense<0.000000e+00> : vector<8x288xf32>
    %5 = tpu.matmul %4, %2, %cst_5 {dimension_numbers = #tpu.dot_dimension_numbers<[1], [0], [0], [1], [0, 0, 1, 1], [], []>} : vector<8x4xbf16>, vector<4x288xbf16>, vector<8x288xf32> -> vector<8x288xf32>
    %6 = arith.addf %0, %5 : vector<8x288xf32>
    %c0_6 = arith.constant 0 : index
    %c0_7 = arith.constant 0 : index
    %c1 = arith.constant 1 : index
    %7 = vector.load %arg1[%c0_6, %c0_7, %c1] : memref<1x4x384xbf16, #tpu.memory_space<vmem>>, vector<1x4x288xbf16>
    %8 = vector.shape_cast %7 : vector<1x4x288xbf16> to vector<4x288xbf16>
    %c1_8 = arith.constant 1 : index
    %c0_9 = arith.constant 0 : index
    %c0_10 = arith.constant 0 : index
    %9 = vector.load %arg2[%c1_8, %c0_9, %c0_10] : memref<9x8x4xbf16, #tpu.memory_space<vmem>>, vector<1x8x4xbf16>
    %10 = vector.shape_cast %9 : vector<1x8x4xbf16> to vector<8x4xbf16>
    %cst_11 = arith.constant dense<0.000000e+00> : vector<8x288xf32>
    %11 = tpu.matmul %10, %8, %cst_11 {dimension_numbers = #tpu.dot_dimension_numbers<[1], [0], [0], [1], [0, 0, 1, 1], [], []>} : vector<8x4xbf16>, vector<4x288xbf16>, vector<8x288xf32> -> vector<8x288xf32>
    %12 = arith.addf %6, %11 : vector<8x288xf32>
    %c0_12 = arith.constant 0 : index
    %c0_13 = arith.constant 0 : index
    %c2 = arith.constant 2 : index
    %13 = vector.load %arg1[%c0_12, %c0_13, %c2] : memref<1x4x384xbf16, #tpu.memory_space<vmem>>, vector<1x4x288xbf16>
    %14 = vector.shape_cast %13 : vector<1x4x288xbf16> to vector<4x288xbf16>
    %c2_14 = arith.constant 2 : index
    %c0_15 = arith.constant 0 : index
    %c0_16 = arith.constant 0 : index
    %15 = vector.load %arg2[%c2_14, %c0_15, %c0_16] : memref<9x8x4xbf16, #tpu.memory_space<vmem>>, vector<1x8x4xbf16>
    %16 = vector.shape_cast %15 : vector<1x8x4xbf16> to vector<8x4xbf16>
    %cst_17 = arith.constant dense<0.000000e+00> : vector<8x288xf32>
    %17 = tpu.matmul %16, %14, %cst_17 {dimension_numbers = #tpu.dot_dimension_numbers<[1], [0], [0], [1], [0, 0, 1, 1], [], []>} : vector<8x4xbf16>, vector<4x288xbf16>, vector<8x288xf32> -> vector<8x288xf32>
    %18 = arith.addf %12, %17 : vector<8x288xf32>
    %c0_18 = arith.constant 0 : index
    %c0_19 = arith.constant 0 : index
    %c18 = arith.constant 18 : index
    %19 = vector.load %arg1[%c0_18, %c0_19, %c18] : memref<1x4x384xbf16, #tpu.memory_space<vmem>>, vector<1x4x288xbf16>
    %20 = vector.shape_cast %19 : vector<1x4x288xbf16> to vector<4x288xbf16>
    %c3 = arith.constant 3 : index
    %c0_20 = arith.constant 0 : index
    %c0_21 = arith.constant 0 : index
    %21 = vector.load %arg2[%c3, %c0_20, %c0_21] : memref<9x8x4xbf16, #tpu.memory_space<vmem>>, vector<1x8x4xbf16>
    %22 = vector.shape_cast %21 : vector<1x8x4xbf16> to vector<8x4xbf16>
    %cst_22 = arith.constant dense<0.000000e+00> : vector<8x288xf32>
    %23 = tpu.matmul %22, %20, %cst_22 {dimension_numbers = #tpu.dot_dimension_numbers<[1], [0], [0], [1], [0, 0, 1, 1], [], []>} : vector<8x4xbf16>, vector<4x288xbf16>, vector<8x288xf32> -> vector<8x288xf32>
    %24 = arith.addf %18, %23 : vector<8x288xf32>
    %c0_23 = arith.constant 0 : index
    %c0_24 = arith.constant 0 : index
    %c19 = arith.constant 19 : index
    %25 = vector.load %arg1[%c0_23, %c0_24, %c19] : memref<1x4x384xbf16, #tpu.memory_space<vmem>>, vector<1x4x288xbf16>
    %26 = vector.shape_cast %25 : vector<1x4x288xbf16> to vector<4x288xbf16>
    %c4 = arith.constant 4 : index
    %c0_25 = arith.constant 0 : index
    %c0_26 = arith.constant 0 : index
    %27 = vector.load %arg2[%c4, %c0_25, %c0_26] : memref<9x8x4xbf16, #tpu.memory_space<vmem>>, vector<1x8x4xbf16>
    %28 = vector.shape_cast %27 : vector<1x8x4xbf16> to vector<8x4xbf16>
    %cst_27 = arith.constant dense<0.000000e+00> : vector<8x288xf32>
    %29 = tpu.matmul %28, %26, %cst_27 {dimension_numbers = #tpu.dot_dimension_numbers<[1], [0], [0], [1], [0, 0, 1, 1], [], []>} : vector<8x4xbf16>, vector<4x288xbf16>, vector<8x288xf32> -> vector<8x288xf32>
    %30 = arith.addf %24, %29 : vector<8x288xf32>
    %c0_28 = arith.constant 0 : index
    %c0_29 = arith.constant 0 : index
    %c20 = arith.constant 20 : index
    %31 = vector.load %arg1[%c0_28, %c0_29, %c20] : memref<1x4x384xbf16, #tpu.memory_space<vmem>>, vector<1x4x288xbf16>
    %32 = vector.shape_cast %31 : vector<1x4x288xbf16> to vector<4x288xbf16>
    %c5 = arith.constant 5 : index
    %c0_30 = arith.constant 0 : index
    %c0_31 = arith.constant 0 : index
    %33 = vector.load %arg2[%c5, %c0_30, %c0_31] : memref<9x8x4xbf16, #tpu.memory_space<vmem>>, vector<1x8x4xbf16>
    %34 = vector.shape_cast %33 : vector<1x8x4xbf16> to vector<8x4xbf16>
    %cst_32 = arith.constant dense<0.000000e+00> : vector<8x288xf32>
    %35 = tpu.matmul %34, %32, %cst_32 {dimension_numbers = #tpu.dot_dimension_numbers<[1], [0], [0], [1], [0, 0, 1, 1], [], []>} : vector<8x4xbf16>, vector<4x288xbf16>, vector<8x288xf32> -> vector<8x288xf32>
    %36 = arith.addf %30, %35 : vector<8x288xf32>
    %c0_33 = arith.constant 0 : index
    %c0_34 = arith.constant 0 : index
    %c36 = arith.constant 36 : index
    %37 = vector.load %arg1[%c0_33, %c0_34, %c36] : memref<1x4x384xbf16, #tpu.memory_space<vmem>>, vector<1x4x288xbf16>
    %38 = vector.shape_cast %37 : vector<1x4x288xbf16> to vector<4x288xbf16>
    %c6 = arith.constant 6 : index
    %c0_35 = arith.constant 0 : index
    %c0_36 = arith.constant 0 : index
    %39 = vector.load %arg2[%c6, %c0_35, %c0_36] : memref<9x8x4xbf16, #tpu.memory_space<vmem>>, vector<1x8x4xbf16>
    %40 = vector.shape_cast %39 : vector<1x8x4xbf16> to vector<8x4xbf16>
    %cst_37 = arith.constant dense<0.000000e+00> : vector<8x288xf32>
    %41 = tpu.matmul %40, %38, %cst_37 {dimension_numbers = #tpu.dot_dimension_numbers<[1], [0], [0], [1], [0, 0, 1, 1], [], []>} : vector<8x4xbf16>, vector<4x288xbf16>, vector<8x288xf32> -> vector<8x288xf32>
    %42 = arith.addf %36, %41 : vector<8x288xf32>
    %c0_38 = arith.constant 0 : index
    %c0_39 = arith.constant 0 : index
    %c37 = arith.constant 37 : index
    %43 = vector.load %arg1[%c0_38, %c0_39, %c37] : memref<1x4x384xbf16, #tpu.memory_space<vmem>>, vector<1x4x288xbf16>
    %44 = vector.shape_cast %43 : vector<1x4x288xbf16> to vector<4x288xbf16>
    %c7 = arith.constant 7 : index
    %c0_40 = arith.constant 0 : index
    %c0_41 = arith.constant 0 : index
    %45 = vector.load %arg2[%c7, %c0_40, %c0_41] : memref<9x8x4xbf16, #tpu.memory_space<vmem>>, vector<1x8x4xbf16>
    %46 = vector.shape_cast %45 : vector<1x8x4xbf16> to vector<8x4xbf16>
    %cst_42 = arith.constant dense<0.000000e+00> : vector<8x288xf32>
    %47 = tpu.matmul %46, %44, %cst_42 {dimension_numbers = #tpu.dot_dimension_numbers<[1], [0], [0], [1], [0, 0, 1, 1], [], []>} : vector<8x4xbf16>, vector<4x288xbf16>, vector<8x288xf32> -> vector<8x288xf32>
    %48 = arith.addf %42, %47 : vector<8x288xf32>
    %c0_43 = arith.constant 0 : index
    %c0_44 = arith.constant 0 : index
    %c38 = arith.constant 38 : index
    %49 = vector.load %arg1[%c0_43, %c0_44, %c38] : memref<1x4x384xbf16, #tpu.memory_space<vmem>>, vector<1x4x288xbf16>
    %50 = vector.shape_cast %49 : vector<1x4x288xbf16> to vector<4x288xbf16>
    %c8 = arith.constant 8 : index
    %c0_45 = arith.constant 0 : index
    %c0_46 = arith.constant 0 : index
    %51 = vector.load %arg2[%c8, %c0_45, %c0_46] : memref<9x8x4xbf16, #tpu.memory_space<vmem>>, vector<1x8x4xbf16>
    %52 = vector.shape_cast %51 : vector<1x8x4xbf16> to vector<8x4xbf16>
    %cst_47 = arith.constant dense<0.000000e+00> : vector<8x288xf32>
    %53 = tpu.matmul %52, %50, %cst_47 {dimension_numbers = #tpu.dot_dimension_numbers<[1], [0], [0], [1], [0, 0, 1, 1], [], []>} : vector<8x4xbf16>, vector<4x288xbf16>, vector<8x288xf32> -> vector<8x288xf32>
    %54 = arith.addf %48, %53 : vector<8x288xf32>
    %c0_48 = arith.constant 0 : index
    %c0_49 = arith.constant 0 : index
    %55 = vector.load %arg3[%c0_48, %c0_49] : memref<8x1xf32, #tpu.memory_space<vmem>>, vector<8x1xf32>
    %56 = vector.broadcast %55 : vector<8x1xf32> to vector<8x288xf32>
    %57 = arith.addf %54, %56 : vector<8x288xf32>
    %cst_50 = arith.constant 0.000000e+00 : f32
    %58 = vector.broadcast %cst_50 : f32 to vector<8x288xf32>
    %59 = arith.maximumf %57, %58 : vector<8x288xf32>
    %c0_51 = arith.constant 0 : index
    %c0_52 = arith.constant 0 : index
    %60 = vector.load %arg6[%c0_51, %c0_52] : memref<1x288xbf16, #tpu.memory_space<vmem>>, vector<1x288xbf16>
    %61 = arith.extf %60 : vector<1x288xbf16> to vector<1x288xf32>
    %62 = vector.broadcast %61 : vector<1x288xf32> to vector<8x288xf32>
    %63 = arith.mulf %59, %62 : vector<8x288xf32>
    %cst_53 = arith.constant 0.000000e+00 : bf16
    %64 = vector.broadcast %cst_53 : bf16 to vector<8x128xbf16>
    %c0_54 = arith.constant 0 : index
    %c0_55 = arith.constant 0 : index
    %65 = vector.load %arg10[%c0_54, %c0_55] : memref<8x512xbf16, #tpu.memory_space<vmem>>, vector<8x128xbf16>
    tpu.vector_store %arg10[%c0_54, %c0_55], %64 {strides = array<i32>} : memref<8x512xbf16, #tpu.memory_space<vmem>>, vector<8x128xbf16>,
    %cst_56 = arith.constant 0.000000e+00 : bf16
    %66 = vector.broadcast %cst_56 : bf16 to vector<8x96xbf16>
    %c0_57 = arith.constant 0 : index
    %c416 = arith.constant 416 : index
    %67 = vector.load %arg10[%c0_57, %c416] : memref<8x512xbf16, #tpu.memory_space<vmem>>, vector<8x96xbf16>
    tpu.vector_store %arg10[%c0_57, %c416], %66 {strides = array<i32>} : memref<8x512xbf16, #tpu.memory_space<vmem>>, vector<8x96xbf16>,
    %68 = arith.truncf %63 : vector<8x288xf32> to vector<8x288xbf16>
    %c0_58 = arith.constant 0 : index
    %c128 = arith.constant 128 : index
    %69 = vector.load %arg10[%c0_58, %c128] : memref<8x512xbf16, #tpu.memory_space<vmem>>, vector<8x288xbf16>
    tpu.vector_store %arg10[%c0_58, %c128], %68 {strides = array<i32>} : memref<8x512xbf16, #tpu.memory_space<vmem>>, vector<8x288xbf16>,
    %cst_59 = arith.constant 0.000000e+00 : f32
    %70 = vector.broadcast %cst_59 : f32 to vector<8x288xf32>
    %c0_60 = arith.constant 0 : index
    %c109 = arith.constant 109 : index
    %71 = vector.load %arg10[%c0_60, %c109] : memref<8x512xbf16, #tpu.memory_space<vmem>>, vector<8x288xbf16>
    %c0_61 = arith.constant 0 : index
    %c0_62 = arith.constant 0 : index
    %c0_63 = arith.constant 0 : index
    %72 = vector.load %arg4[%c0_61, %c0_62, %c0_63] : memref<9x8x8xbf16, #tpu.memory_space<vmem>>, vector<1x8x8xbf16>
    %73 = vector.shape_cast %72 : vector<1x8x8xbf16> to vector<8x8xbf16>
    %cst_64 = arith.constant dense<0.000000e+00> : vector<8x288xf32>
    %74 = tpu.matmul %73, %71, %cst_64 {dimension_numbers = #tpu.dot_dimension_numbers<[1], [0], [0], [1], [0, 0, 1, 1], [], []>} : vector<8x8xbf16>, vector<8x288xbf16>, vector<8x288xf32> -> vector<8x288xf32>
    %75 = arith.addf %70, %74 : vector<8x288xf32>
    %c0_65 = arith.constant 0 : index
    %c110 = arith.constant 110 : index
    %76 = vector.load %arg10[%c0_65, %c110] : memref<8x512xbf16, #tpu.memory_space<vmem>>, vector<8x288xbf16>
    %c1_66 = arith.constant 1 : index
    %c0_67 = arith.constant 0 : index
    %c0_68 = arith.constant 0 : index
    %77 = vector.load %arg4[%c1_66, %c0_67, %c0_68] : memref<9x8x8xbf16, #tpu.memory_space<vmem>>, vector<1x8x8xbf16>
    %78 = vector.shape_cast %77 : vector<1x8x8xbf16> to vector<8x8xbf16>
    %cst_69 = arith.constant dense<0.000000e+00> : vector<8x288xf32>
    %79 = tpu.matmul %78, %76, %cst_69 {dimension_numbers = #tpu.dot_dimension_numbers<[1], [0], [0], [1], [0, 0, 1, 1], [], []>} : vector<8x8xbf16>, vector<8x288xbf16>, vector<8x288xf32> -> vector<8x288xf32>
    %80 = arith.addf %75, %79 : vector<8x288xf32>
    %c0_70 = arith.constant 0 : index
    %c111 = arith.constant 111 : index
    %81 = vector.load %arg10[%c0_70, %c111] : memref<8x512xbf16, #tpu.memory_space<vmem>>, vector<8x288xbf16>
    %c2_71 = arith.constant 2 : index
    %c0_72 = arith.constant 0 : index
    %c0_73 = arith.constant 0 : index
    %82 = vector.load %arg4[%c2_71, %c0_72, %c0_73] : memref<9x8x8xbf16, #tpu.memory_space<vmem>>, vector<1x8x8xbf16>
    %83 = vector.shape_cast %82 : vector<1x8x8xbf16> to vector<8x8xbf16>
    %cst_74 = arith.constant dense<0.000000e+00> : vector<8x288xf32>
    %84 = tpu.matmul %83, %81, %cst_74 {dimension_numbers = #tpu.dot_dimension_numbers<[1], [0], [0], [1], [0, 0, 1, 1], [], []>} : vector<8x8xbf16>, vector<8x288xbf16>, vector<8x288xf32> -> vector<8x288xf32>
    %85 = arith.addf %80, %84 : vector<8x288xf32>
    %c0_75 = arith.constant 0 : index
    %c127 = arith.constant 127 : index
    %86 = vector.load %arg10[%c0_75, %c127] : memref<8x512xbf16, #tpu.memory_space<vmem>>, vector<8x288xbf16>
    %c3_76 = arith.constant 3 : index
    %c0_77 = arith.constant 0 : index
    %c0_78 = arith.constant 0 : index
    %87 = vector.load %arg4[%c3_76, %c0_77, %c0_78] : memref<9x8x8xbf16, #tpu.memory_space<vmem>>, vector<1x8x8xbf16>
    %88 = vector.shape_cast %87 : vector<1x8x8xbf16> to vector<8x8xbf16>
    %cst_79 = arith.constant dense<0.000000e+00> : vector<8x288xf32>
    %89 = tpu.matmul %88, %86, %cst_79 {dimension_numbers = #tpu.dot_dimension_numbers<[1], [0], [0], [1], [0, 0, 1, 1], [], []>} : vector<8x8xbf16>, vector<8x288xbf16>, vector<8x288xf32> -> vector<8x288xf32>
    %90 = arith.addf %85, %89 : vector<8x288xf32>
    %c0_80 = arith.constant 0 : index
    %c128_81 = arith.constant 128 : index
    %91 = vector.load %arg10[%c0_80, %c128_81] : memref<8x512xbf16, #tpu.memory_space<vmem>>, vector<8x288xbf16>
    %c4_82 = arith.constant 4 : index
    %c0_83 = arith.constant 0 : index
    %c0_84 = arith.constant 0 : index
    %92 = vector.load %arg4[%c4_82, %c0_83, %c0_84] : memref<9x8x8xbf16, #tpu.memory_space<vmem>>, vector<1x8x8xbf16>
    %93 = vector.shape_cast %92 : vector<1x8x8xbf16> to vector<8x8xbf16>
    %cst_85 = arith.constant dense<0.000000e+00> : vector<8x288xf32>
    %94 = tpu.matmul %93, %91, %cst_85 {dimension_numbers = #tpu.dot_dimension_numbers<[1], [0], [0], [1], [0, 0, 1, 1], [], []>} : vector<8x8xbf16>, vector<8x288xbf16>, vector<8x288xf32> -> vector<8x288xf32>
    %95 = arith.addf %90, %94 : vector<8x288xf32>
    %c0_86 = arith.constant 0 : index
    %c129 = arith.constant 129 : index
    %96 = vector.load %arg10[%c0_86, %c129] : memref<8x512xbf16, #tpu.memory_space<vmem>>, vector<8x288xbf16>
    %c5_87 = arith.constant 5 : index
    %c0_88 = arith.constant 0 : index
    %c0_89 = arith.constant 0 : index
    %97 = vector.load %arg4[%c5_87, %c0_88, %c0_89] : memref<9x8x8xbf16, #tpu.memory_space<vmem>>, vector<1x8x8xbf16>
    %98 = vector.shape_cast %97 : vector<1x8x8xbf16> to vector<8x8xbf16>
    %cst_90 = arith.constant dense<0.000000e+00> : vector<8x288xf32>
    %99 = tpu.matmul %98, %96, %cst_90 {dimension_numbers = #tpu.dot_dimension_numbers<[1], [0], [0], [1], [0, 0, 1, 1], [], []>} : vector<8x8xbf16>, vector<8x288xbf16>, vector<8x288xf32> -> vector<8x288xf32>
    %100 = arith.addf %95, %99 : vector<8x288xf32>
    %c0_91 = arith.constant 0 : index
    %c145 = arith.constant 145 : index
    %101 = vector.load %arg10[%c0_91, %c145] : memref<8x512xbf16, #tpu.memory_space<vmem>>, vector<8x288xbf16>
    %c6_92 = arith.constant 6 : index
    %c0_93 = arith.constant 0 : index
    %c0_94 = arith.constant 0 : index
    %102 = vector.load %arg4[%c6_92, %c0_93, %c0_94] : memref<9x8x8xbf16, #tpu.memory_space<vmem>>, vector<1x8x8xbf16>
    %103 = vector.shape_cast %102 : vector<1x8x8xbf16> to vector<8x8xbf16>
    %cst_95 = arith.constant dense<0.000000e+00> : vector<8x288xf32>
    %104 = tpu.matmul %103, %101, %cst_95 {dimension_numbers = #tpu.dot_dimension_numbers<[1], [0], [0], [1], [0, 0, 1, 1], [], []>} : vector<8x8xbf16>, vector<8x288xbf16>, vector<8x288xf32> -> vector<8x288xf32>
    %105 = arith.addf %100, %104 : vector<8x288xf32>
    %c0_96 = arith.constant 0 : index
    %c146 = arith.constant 146 : index
    %106 = vector.load %arg10[%c0_96, %c146] : memref<8x512xbf16, #tpu.memory_space<vmem>>, vector<8x288xbf16>
    %c7_97 = arith.constant 7 : index
    %c0_98 = arith.constant 0 : index
    %c0_99 = arith.constant 0 : index
    %107 = vector.load %arg4[%c7_97, %c0_98, %c0_99] : memref<9x8x8xbf16, #tpu.memory_space<vmem>>, vector<1x8x8xbf16>
    %108 = vector.shape_cast %107 : vector<1x8x8xbf16> to vector<8x8xbf16>
    %cst_100 = arith.constant dense<0.000000e+00> : vector<8x288xf32>
    %109 = tpu.matmul %108, %106, %cst_100 {dimension_numbers = #tpu.dot_dimension_numbers<[1], [0], [0], [1], [0, 0, 1, 1], [], []>} : vector<8x8xbf16>, vector<8x288xbf16>, vector<8x288xf32> -> vector<8x288xf32>
    %110 = arith.addf %105, %109 : vector<8x288xf32>
    %c0_101 = arith.constant 0 : index
    %c147 = arith.constant 147 : index
    %111 = vector.load %arg10[%c0_101, %c147] : memref<8x512xbf16, #tpu.memory_space<vmem>>, vector<8x288xbf16>
    %c8_102 = arith.constant 8 : index
    %c0_103 = arith.constant 0 : index
    %c0_104 = arith.constant 0 : index
    %112 = vector.load %arg4[%c8_102, %c0_103, %c0_104] : memref<9x8x8xbf16, #tpu.memory_space<vmem>>, vector<1x8x8xbf16>
    %113 = vector.shape_cast %112 : vector<1x8x8xbf16> to vector<8x8xbf16>
    %cst_105 = arith.constant dense<0.000000e+00> : vector<8x288xf32>
    %114 = tpu.matmul %113, %111, %cst_105 {dimension_numbers = #tpu.dot_dimension_numbers<[1], [0], [0], [1], [0, 0, 1, 1], [], []>} : vector<8x8xbf16>, vector<8x288xbf16>, vector<8x288xf32> -> vector<8x288xf32>
    %115 = arith.addf %110, %114 : vector<8x288xf32>
    %c0_106 = arith.constant 0 : index
    %c0_107 = arith.constant 0 : index
    %116 = vector.load %arg5[%c0_106, %c0_107] : memref<8x1xf32, #tpu.memory_space<vmem>>, vector<8x1xf32>
    %117 = vector.broadcast %116 : vector<8x1xf32> to vector<8x288xf32>
    %118 = arith.addf %115, %117 : vector<8x288xf32>
    %c0_108 = arith.constant 0 : index
    %c0_109 = arith.constant 0 : index
    %c19_110 = arith.constant 19 : index
    %119 = vector.load %arg1[%c0_108, %c0_109, %c19_110] : memref<1x4x384xbf16, #tpu.memory_space<vmem>>, vector<1x4x288xbf16>
    %120 = vector.shape_cast %119 : vector<1x4x288xbf16> to vector<4x288xbf16>
    %c0_111 = arith.constant 0 : index
    %c0_112 = arith.constant 0 : index
    %121 = vector.load %arg7[%c0_111, %c0_112] : memref<8x4xbf16, #tpu.memory_space<vmem>>, vector<8x4xbf16>
    %cst_113 = arith.constant dense<0.000000e+00> : vector<8x288xf32>
    %122 = tpu.matmul %121, %120, %cst_113 {dimension_numbers = #tpu.dot_dimension_numbers<[1], [0], [0], [1], [0, 0, 1, 1], [], []>} : vector<8x4xbf16>, vector<4x288xbf16>, vector<8x288xf32> -> vector<8x288xf32>
    %c0_114 = arith.constant 0 : index
    %c0_115 = arith.constant 0 : index
    %123 = vector.load %arg8[%c0_114, %c0_115] : memref<8x1xf32, #tpu.memory_space<vmem>>, vector<8x1xf32>
    %124 = vector.broadcast %123 : vector<8x1xf32> to vector<8x288xf32>
    %125 = arith.addf %122, %124 : vector<8x288xf32>
    %126 = arith.addf %118, %125 : vector<8x288xf32>
    %cst_116 = arith.constant 0.000000e+00 : f32
    %127 = vector.broadcast %cst_116 : f32 to vector<8x288xf32>
    %128 = arith.maximumf %126, %127 : vector<8x288xf32>
    %c0_117 = arith.constant 0 : index
    %c0_118 = arith.constant 0 : index
    %c0_119 = arith.constant 0 : index
    %129 = vector.load %arg9[%c0_117, %c0_118, %c0_119] : memref<1x8x288xf32, #tpu.memory_space<vmem>>, vector<1x8x288xf32>
    %130 = vector.shape_cast %129 : vector<1x8x288xf32> to vector<8x288xf32>
    %131 = vector.shape_cast %128 : vector<8x288xf32> to vector<1x8x288xf32>
    tpu.vector_store %arg9[%c0_117, %c0_118, %c0_119], %131 {strides = array<i32>} : memref<1x8x288xf32, #tpu.memory_space<vmem>>, vector<1x8x288xf32>,
    return
  }
  func.func @transform_0(%arg0: i32) -> (i32, i32, i32) {
    %c0_i32 = arith.constant 0 : i32
    %c0_i32_0 = arith.constant 0 : i32
    %c0_i32_1 = arith.constant 0 : i32
    return %arg0, %c0_i32, %c0_i32_0 : i32, i32, i32
  }
  func.func @transform_1(%arg0: i32) -> (i32, i32, i32) {
    %c0_i32 = arith.constant 0 : i32
    %c0_i32_0 = arith.constant 0 : i32
    %c0_i32_1 = arith.constant 0 : i32
    %c0_i32_2 = arith.constant 0 : i32
    return %c0_i32, %c0_i32_0, %c0_i32_1 : i32, i32, i32
  }
  func.func @transform_2(%arg0: i32) -> (i32, i32) {
    %c0_i32 = arith.constant 0 : i32
    %c0_i32_0 = arith.constant 0 : i32
    %c0_i32_1 = arith.constant 0 : i32
    return %c0_i32, %c0_i32_0 : i32, i32
  }
  func.func @transform_3(%arg0: i32) -> (i32, i32, i32) {
    %c0_i32 = arith.constant 0 : i32
    %c0_i32_0 = arith.constant 0 : i32
    %c0_i32_1 = arith.constant 0 : i32
    %c0_i32_2 = arith.constant 0 : i32
    return %c0_i32, %c0_i32_0, %c0_i32_1 : i32, i32, i32
  }
  func.func @transform_4(%arg0: i32) -> (i32, i32) {
    %c0_i32 = arith.constant 0 : i32
    %c0_i32_0 = arith.constant 0 : i32
    %c0_i32_1 = arith.constant 0 : i32
    return %c0_i32, %c0_i32_0 : i32, i32
  }
  func.func @transform_5(%arg0: i32) -> (i32, i32) {
    %c0_i32 = arith.constant 0 : i32
    %c0_i32_0 = arith.constant 0 : i32
    %c0_i32_1 = arith.constant 0 : i32
    return %c0_i32, %c0_i32_0 : i32, i32
  }
  func.func @transform_6(%arg0: i32) -> (i32, i32) {
    %c0_i32 = arith.constant 0 : i32
    %c0_i32_0 = arith.constant 0 : i32
    %c0_i32_1 = arith.constant 0 : i32
    return %c0_i32, %c0_i32_0 : i32, i32
  }
  func.func @transform_7(%arg0: i32) -> (i32, i32) {
    %c0_i32 = arith.constant 0 : i32
    %c0_i32_0 = arith.constant 0 : i32
    %c0_i32_1 = arith.constant 0 : i32
    return %c0_i32, %c0_i32_0 : i32, i32
  }
  func.func @transform_8(%arg0: i32) -> (i32, i32, i32) {
    %c0_i32 = arith.constant 0 : i32
    %c0_i32_0 = arith.constant 0 : i32
    %c0_i32_1 = arith.constant 0 : i32
    return %arg0, %c0_i32, %c0_i32_0 : i32, i32, i32
  }
}

</mosaic_0001>

<bundles_post_ra>
// kernel: basic_block_forward.1
= control target key start
LH: loop header
LB: loop body
LE: loop exit
PB: predicated region body
PF: predicated region fallthrough
CT: control target
= control target key end

     0   :  { %s3082_s27 = smov 0   ;;  %s3454_s0 = inlined_call_operand.vmem [shape: bf16[2,4,384], index: 0, kind: input, shape index: {}]   ;;  %s3455_s1 = inlined_call_operand.vmem [shape: bf16[9,8,4], index: 1, kind: input, shape index: {}]   ;;  %s3456_s2 = inlined_call_operand.vmem [shape: f32[8,1], index: 2, kind: input, shape index: {}]   ;;  %s3457_s3 = inlined_call_operand.vmem [shape: bf16[9,8,8], index: 3, kind: input, shape index: {}]   ;;  %s3458_s4 = inlined_call_operand.vmem [shape: f32[8,1], index: 4, kind: input, shape index: {}]   ;;  %s3459_s5 = inlined_call_operand.vmem [shape: bf16[1,288], index: 5, kind: input, shape index: {}]   ;;  %s3460_s6 = inlined_call_operand.vmem [shape: bf16[8,4], index: 6, kind: input, shape index: {}]   ;;  %s3461_s7 = inlined_call_operand.vmem [shape: f32[8,1], index: 7, kind: input, shape index: {}]   ;;  %s3462_s8 = inlined_call_operand.vmem [shape: f32[2,8,288], index: 8, kind: output, shape index: {}]  }
   0x1 LB: > { %s2644_s28 = sadd.s32 4294967295, %s3018_s27   ;;  %p2648_p0 = scmp.ge.s32.totalorder %s3018_s27, 1  ;;  %s3018_s27 = sphi %s3082_s27, %s18_s27  }
   0x2   : > { %p262_p1 = scmp.lt.s32.totalorder %s3018_s27, 3 }
   0x4   : > { %p263_p2 = pnand %p2648_p0, %p262_p1 }
   0x5   : > { %p296_p3 = scmp.lt.s32.totalorder (!%p263_p2), %s2644_s28, 1  ;;  %v316_v0 = vlaneseq (!%p263_p2)  ;;  %v3020_v1 = vmov (!%p263_p2), 1983009808   ;;  %v3021_v3 = vmov (!%p263_p2), 0.0   ;;  %vm3022_vm0 = vmmov (!%p263_p2), 0   ;;  %s3024_s11 = smov (!%p263_p2), 127  }
   0x6   : > { %266 = sbr.rel (%p263_p2) target bundleno = 894 (0x37e), region = 52  ;;  %v314_v2 = vunpack.c.l.s4 (!%p263_p2), %v3020_v1  ;;  %2775 = vmatprep.subr.bf16.mxu1 (!%p263_p2), %v3021_v3  ;;  %2777 = vmatprep.mubr.msk.bf16.mxu1 (!%p263_p2), %vm3022_vm0, %v3021_v3  ;;  %v3023_v6 = vmov (!%p263_p2), 0   ;;  %s3025_s12 = smov (!%p263_p2), 126   ;;  %v1400_v48 = vld [vmem:[%s3456_s2] sm:$0xff] (!%p263_p2)  ;;  %vm341_vm1 = vcmask (!%p263_p2), 1041408   ;;  %vm334_vm2 = vcmask (!%p263_p2), 1039360  }
   0x7   : > { %v3093_v4 = vshrl.u32 (!%p263_p2), %v316_v0, 7  ;;  %383 = vmatprep.mubr.bf16.mxu0 (!%p263_p2), %v3023_v6  ;;  %1445 = vst [vmem:[#allocation2] sm:$0xf] (!%p263_p2), %v3023_v6  ;;  %2994 = vset.pattern.permute.xlu0 (!%p263_p2), %v3023_v6  ;;  %s3026_s13 = smov (!%p263_p2), 110   ;;  %s3027_s14 = smov (!%p263_p2), 109   ;;  %vm337_vm3 = vcmask (!%p263_p2), 31744  }
   0x8   : > { %v315_v5 = vunpack.c.0.s8 (!%p263_p2), %v314_v2  ;;  %2995 = vset.pattern.permute.xlu1 (!%p263_p2), %v3023_v6  ;;  %s3028_s15 = smov (!%p263_p2), 108   ;;  %s3029_s16 = smov (!%p263_p2), 92   ;;  %v2651_v53 = vld [vmem:[%s3455_s1 + $0x4] sm:$0xf] (!%p263_p2)  ;;  %vm551_vm4 = vcmask (!%p263_p2), 1031168   ;;  %vm676_vm5 = vcmask (!%p263_p2), 900096  }
   0x9   : > { %s3030_s17 = smov (!%p263_p2), 91   ;;  %s3031_s18 = smov (!%p263_p2), 90   ;;  %v308_v63 = vld [vmem:[%s3455_s1] sm:$0xf] (!%p263_p2)  ;;  %vm801_vm6 = vcmask (!%p263_p2), 891904   ;;  %vm926_vm7 = vcmask (!%p263_p2), 883712  }
   0xa   : > { %v3102_v7 = vsub.s32 (!%p263_p2), %v315_v5, %v3093_v4  ;;  %vm1051_vm8 = vcmask (!%p263_p2), 752640   ;;  %vm1176_vm9 = vcmask (!%p263_p2), 744448   ;;  %vm1301_vm10 = vcmask (!%p263_p2), 736256   ;;  %s3032_s25 = smov (!%p263_p2), 18   ;;  %s3033_s26 = smov (!%p263_p2), 19  }
   0xb   : > { %vm1446_vm11 = vcmask (!%p263_p2), 1043712   ;;  %vm1462_vm12 = vcmask (!%p263_p2), 257024   ;;  %s3035_s30 = smov (!%p263_p2), 1   ;;  %s3036_s9 = smov (!%p263_p2), 111   ;;  %vm1487_vm13 = vcmask (!%p263_p2), 146432   ;;  %vm1495_vm14 = vcmask (!%p263_p2), 1043456  }
   0xc   : > { %1447 = vst.msk [vmem:[#allocation2 + $0xc] sm:$0xf] (!%p263_p2), %vm1446_vm11, %v3023_v6  ;;  %vm1491_vm15 = vcmask (!%p263_p2), 64512  }
   0xd   : > { %s3464_s28 = smov (!%p296_p3, %s2644_s28), 1 }
   0xe   : > { %s2967_s29 = smul.u32 6, %s3464_s28 }
  0x10   : > { %s3108_s10 = scalar_lea.vmem %s3454_s0, %s2967_s29  ;;  %s3034_s29 = smov 17  }
  0x11   : > { %v307_v8 = vld [vmem:[%s3108_s10] sm:$0x3f] }
  0x12   : > { %v3112_v9 = vrot.slane %v307_v8, %v3102_v7  ;;  %v312_v10 = vcombine.high %v307_v8, %v307_v8  ;;  %v525_v11 = vld [vmem:[%s3108_s10] sm:$0x3f] }
  0x13   : > { %v536_v14 = vrot.slane %v525_v11, %v3102_v7  ;;  %v529_v15 = vcombine.high %v525_v11, %v525_v11  ;;  %v650_v17 = vld [vmem:[%s3108_s10] sm:$0x3f] }
  0x14   : > { %328 = vrot.lane.b32.xlu0 %v3112_v9, %s3024_s11  ;;  %v3118_v12 = vrot.slane %v312_v10, %v3102_v7  ;;  %v3122_v13 = vcombine.high %v3112_v9, %v3112_v9  ;;  %v661_v19 = vrot.slane %v650_v17, %v3102_v7  ;;  %v654_v20 = vcombine.high %v650_v17, %v650_v17  ;;  %v775_v22 = vld [vmem:[%s3108_s10] sm:$0x3f] }
  0x15   : > { %v544_v16 = vcombine.high %v536_v14, %v536_v14  ;;  %v543_v18 = vrot.slane %v529_v15, %v3102_v7  ;;  %v786_v24 = vrot.slane %v775_v22, %v3102_v7  ;;  %v779_v25 = vcombine.high %v775_v22, %v775_v22  ;;  %v900_v27 = vld [vmem:[%s3108_s10] sm:$0x3f] }
  0x16   : > { %332 = vrot.lane.b32.xlu1 %v3118_v12, %s3024_s11  ;;  %v669_v21 = vcombine.high %v661_v19, %v661_v19  ;;  %v668_v23 = vrot.slane %v654_v20, %v3102_v7  ;;  %v911_v29 = vrot.slane %v900_v27, %v3102_v7  ;;  %v904_v30 = vcombine.high %v900_v27, %v900_v27  ;;  %v1025_v32 = vld [vmem:[%s3108_s10] sm:$0x3f] }
  0x17   : > { %v794_v26 = vcombine.high %v786_v24, %v786_v24  ;;  %v793_v28 = vrot.slane %v779_v25, %v3102_v7  ;;  %v1036_v34 = vrot.slane %v1025_v32, %v3102_v7  ;;  %v1029_v35 = vcombine.high %v1025_v32, %v1025_v32  ;;  %v1150_v37 = vld [vmem:[%s3108_s10] sm:$0x3f] }
  0x18   : > { %330 = vrot.lane.b32.xlu0 %v3122_v13, %s3024_s11  ;;  %v919_v31 = vcombine.high %v911_v29, %v911_v29  ;;  %v918_v33 = vrot.slane %v904_v30, %v3102_v7  ;;  %v1161_v39 = vrot.slane %v1150_v37, %v3102_v7  ;;  %v1154_v40 = vcombine.high %v1150_v37, %v1150_v37  ;;  %v1275_v42 = vld [vmem:[%s3108_s10] sm:$0x3f]  ;;  %v2670_v37 = vld [vmem:[%s3455_s1 + $0x14] sm:$0xf] }
  0x19   : > { %v1044_v36 = vcombine.high %v1036_v34, %v1036_v34  ;;  %v1043_v38 = vrot.slane %v1029_v35, %v3102_v7  ;;  %v1286_v44 = vrot.slane %v1275_v42, %v3102_v7  ;;  %v1279_v45 = vcombine.high %v1275_v42, %v1275_v42 }
  0x1a   : > { %545 = vrot.lane.b32.xlu1 %v536_v14, %s3025_s12  ;;  %v1169_v41 = vcombine.high %v1161_v39, %v1161_v39  ;;  %v1168_v43 = vrot.slane %v1154_v40, %v3102_v7  ;;  %v442_v56 = vsel %vm341_vm1, %v3118_v12, 0  ;;  %v436_v59 = vsel %vm341_vm1, %v3112_v9, 0  ;;  %v2658_v12 = vld [vmem:[%s3455_s1 + $0x8] sm:$0xf] }
  0x1b   : > { %v1294_v46 = vcombine.high %v1286_v44, %v1286_v44  ;;  %v1293_v47 = vrot.slane %v1279_v45, %v3102_v7 }
  0x1c   : > { %547 = vrot.lane.b32.xlu0 %v544_v16, %s3025_s12 }
  0x1e   : > { %549 = vrot.lane.b32.xlu1 %v543_v18, %s3025_s12 }
  0x20   : > { %670 = vrot.lane.b32.xlu0 %v661_v19, %s3026_s13 }
  0x22   : > { %672 = vrot.lane.b32.xlu1 %v669_v21, %s3026_s13  ;;  %v2662_v21 = vld [vmem:[%s3455_s1 + $0xc] sm:$0xf] }
  0x24   : > { %674 = vrot.lane.b32.xlu0 %v668_v23, %s3026_s13 }
  0x26   : > { %795 = vrot.lane.b32.xlu1 %v786_v24, %s3027_s14 }
  0x28   : > { %797 = vrot.lane.b32.xlu0 %v794_v26, %s3027_s14 }
  0x2a   : > { %799 = vrot.lane.b32.xlu1 %v793_v28, %s3027_s14 }
  0x2c   : > { %920 = vrot.lane.b32.xlu0 %v911_v29, %s3028_s15  ;;  %v2666_v29 = vld [vmem:[%s3455_s1 + $0x10] sm:$0xf] }
  0x2e   : > { %922 = vrot.lane.b32.xlu1 %v919_v31, %s3028_s15 }
  0x30   : > { %924 = vrot.lane.b32.xlu0 %v918_v33, %s3028_s15 }
  0x32   : > { %1045 = vrot.lane.b32.xlu1 %v1036_v34, %s3029_s16 }
  0x34   : > { %1047 = vrot.lane.b32.xlu0 %v1044_v36, %s3029_s16 }
  0x36   : > { %1049 = vrot.lane.b32.xlu1 %v1043_v38, %s3029_s16 }
  0x38   : > { %1170 = vrot.lane.b32.xlu0 %v1161_v39, %s3030_s17 }
  0x3a   : > { %1172 = vrot.lane.b32.xlu1 %v1169_v41, %s3030_s17 }
  0x3c   : > { %1174 = vrot.lane.b32.xlu0 %v1168_v43, %s3030_s17 }
  0x3e   : > { %1295 = vrot.lane.b32.xlu1 %v1286_v44, %s3031_s18  ;;  %v2674_v44 = vld [vmem:[%s3455_s1 + $0x18] sm:$0xf] }
  0x40   : > { %1297 = vrot.lane.b32.xlu0 %v1294_v46, %s3031_s18 }
  0x42   : > { %1299 = vrot.lane.b32.xlu1 %v1293_v47, %s3031_s18 }
  0x44   : > { %1403 = vperm.xlu0 %2994, %v1400_v48  }
  0x86   : > { %v329_v49 = vpop.permute.xlu0 %328 }
  0x88   : > { %v333_v50 = vpop.permute.xlu1 %332 }
  0x89   : > { %v349_v51 = vsel %vm341_vm1, %v333_v50, 0 }
  0x8a   : > { %v331_v52 = vpop.permute.xlu0 %330  ;;  %2776 = vmatpush3.bf16.msra.mxu1 %v349_v51  ;;  %v2678_v51 = vld [vmem:[%s3455_s1 + $0x1c] sm:$0xf] }
  0x8b   : > { %v336_v54 = vsel %vm334_vm2, %v331_v52, %v333_v50  ;;  %v335_v55 = vsel %vm334_vm2, %v329_v49, %v331_v52  ;;  %2781 = vmatprep.subr.bf16.mxu1 %v3021_v3 }
  0x8c   : > { %2652 = vmatprep.subr.msk.bf16.mxu0 %vm341_vm1, %v336_v54  ;;  %v343_v57 = vsel %vm341_vm1, %v335_v55, 0  ;;  %v546_v58 = vpop.permute.xlu1 %545  ;;  %v2682_v55 = vld [vmem:[%s3455_s1 + $0x20] sm:$0xf] }
  0x8d   : > { %352 = vmatpush1.bf16.msra.mxu0 %v343_v57  ;;  %2778 = vmatmul.mubr.msk.bf16.vlgmr.msra.gmra.mrb[0].mxu1 %vm337_vm3, %v2651_v53 }
  0x8e   : > { %2782 = vmatpush3.bf16.msra.mxu1 %v442_v56  ;;  %2655 = vmatprep.subr.msk.bf16.mxu0 %vm341_vm1, %v3122_v13  ;;  %v548_v60 = vpop.permute.xlu0 %547 }
  0x8f   : > { %2783 = vmatprep.mubr.msk.bf16.mxu1 %vm3022_vm0, %v3021_v3  ;;  %2787 = vmatprep.subr.bf16.mxu1 %v3021_v3  ;;  %v552_v1 = vsel %vm551_vm4, %v546_v58, %v548_v60 }
  0x90   : > { %2653 = vmatmul.mubr.msk.bf16.vlgmr.msra.gmra.mrb[0].mxu0 %vm337_vm3, %v2651_v53  ;;  %v550_v61 = vpop.permute.xlu1 %549  ;;  %v558_v8 = vsel %vm341_vm1, %v552_v1, 0 }
  0x91   : > { %445 = vmatpush1.bf16.msra.mxu0 %v436_v59  ;;  %v553_v62 = vsel %vm551_vm4, %v548_v60, %v550_v61  ;;  %476 = vmatprep.mubr.bf16.mxu0 %v3023_v6  ;;  %v564_v2 = vsel %vm341_vm1, %v550_v61, 0  ;;  %vm1594_vm4 = vcmask 154624  }
  0x92   : > { %2659 = vmatprep.subr.msk.bf16.mxu0 %vm341_vm1, %v553_v62  ;;  %v671_v0 = vpop.permute.xlu0 %670 }
  0x94   : > { %v673_v5 = vpop.permute.xlu1 %672 }
  0x95   : > { %2784 = vmatmul.mubr.msk.bf16.vlgmr.msra.gmra.mrb[4].mxu1 %vm337_vm3, %v308_v63  ;;  %v677_v15 = vsel %vm676_vm5, %v671_v0, %v673_v5 }
  0x96   : > { %2788 = vmatpush3.bf16.msra.mxu1 %v564_v2  ;;  %2789 = vmatprep.mubr.msk.bf16.mxu1 %vm3022_vm0, %v3021_v3  ;;  %v675_v9 = vpop.permute.xlu0 %674  ;;  %v683_v17 = vsel %vm341_vm1, %v677_v15, 0 }
  0x97   : > { %v678_v10 = vsel %vm676_vm5, %v673_v5, %v675_v9  ;;  %2793 = vmatprep.subr.bf16.mxu1 %v3021_v3  ;;  %v689_v14 = vsel %vm341_vm1, %v675_v9, 0 }
  0x98   : > { %2656 = vmatmul.mubr.msk.bf16.vlgmr.msra.gmra.mrb[4].mxu0 %vm337_vm3, %v308_v63  ;;  %v796_v11 = vpop.permute.xlu1 %795 }
  0x99   : > { %567 = vmatpush1.bf16.msra.mxu0 %v558_v8  ;;  %598 = vmatprep.mubr.bf16.mxu0 %v3023_v6 }
  0x9a   : > { %2663 = vmatprep.subr.msk.bf16.mxu0 %vm341_vm1, %v678_v10  ;;  %v798_v13 = vpop.permute.xlu0 %797 }
  0x9b   : > { %v802_v22 = vsel %vm801_vm6, %v796_v11, %v798_v13 }
  0x9c   : > { %v800_v16 = vpop.permute.xlu1 %799  ;;  %v808_v25 = vsel %vm341_vm1, %v802_v22, 0 }
  0x9d   : > { %2790 = vmatmul.mubr.msk.bf16.vlgmr.msra.gmra.mrb[8].mxu1 %vm337_vm3, %v2658_v12  ;;  %v803_v19 = vsel %vm801_vm6, %v798_v13, %v800_v16  ;;  %v814_v23 = vsel %vm341_vm1, %v800_v16, 0 }
  0x9e   : > { %2794 = vmatpush3.bf16.msra.mxu1 %v689_v14  ;;  %2795 = vmatprep.mubr.msk.bf16.mxu1 %vm3022_vm0, %v3021_v3  ;;  %v921_v18 = vpop.permute.xlu0 %920 }
  0x9f   : > { %2799 = vmatprep.subr.bf16.mxu1 %v3021_v3 }
  0xa0   : > { %2660 = vmatmul.mubr.msk.bf16.vlgmr.msra.gmra.mrb[8].mxu0 %vm337_vm3, %v2658_v12  ;;  %v923_v20 = vpop.permute.xlu1 %922 }
  0xa1   : > { %692 = vmatpush1.bf16.msra.mxu0 %v683_v17  ;;  %723 = vmatprep.mubr.bf16.mxu0 %v3023_v6  ;;  %v927_v31 = vsel %vm926_vm7, %v921_v18, %v923_v20 }
  0xa2   : > { %2667 = vmatprep.subr.msk.bf16.mxu0 %vm341_vm1, %v803_v19  ;;  %v925_v24 = vpop.permute.xlu0 %924  ;;  %v933_v33 = vsel %vm341_vm1, %v927_v31, 0 }
  0xa3   : > { %v928_v27 = vsel %vm926_vm7, %v923_v20, %v925_v24  ;;  %v939_v30 = vsel %vm341_vm1, %v925_v24, 0  ;;  %vm1701_vm7 = vcmask 138240  }
  0xa4   : > { %v1046_v26 = vpop.permute.xlu1 %1045 }
  0xa5   : > { %2796 = vmatmul.mubr.msk.bf16.vlgmr.msra.gmra.mrb[12].mxu1 %vm337_vm3, %v2662_v21 }
  0xa6   : > { %2800 = vmatpush3.bf16.msra.mxu1 %v814_v23  ;;  %2801 = vmatprep.mubr.msk.bf16.mxu1 %vm3022_vm0, %v3021_v3  ;;  %v1048_v28 = vpop.permute.xlu0 %1047 }
  0xa7   : > { %2805 = vmatprep.subr.bf16.mxu1 %v3021_v3  ;;  %v1052_v38 = vsel %vm1051_vm8, %v1046_v26, %v1048_v28 }
  0xa8   : > { %2664 = vmatmul.mubr.msk.bf16.vlgmr.msra.gmra.mrb[12].mxu0 %vm337_vm3, %v2662_v21  ;;  %v1050_v32 = vpop.permute.xlu1 %1049  ;;  %v1058_v41 = vsel %vm341_vm1, %v1052_v38, 0 }
  0xa9   : > { %817 = vmatpush1.bf16.msra.mxu0 %v808_v25  ;;  %848 = vmatprep.mubr.bf16.mxu0 %v3023_v6  ;;  %v1053_v35 = vsel %vm1051_vm8, %v1048_v28, %v1050_v32  ;;  %v1064_v39 = vsel %vm341_vm1, %v1050_v32, 0  ;;  %vm1811_vm8 = vcmask 7168  }
  0xaa   : > { %2671 = vmatprep.subr.msk.bf16.mxu0 %vm341_vm1, %v928_v27  ;;  %v1171_v34 = vpop.permute.xlu0 %1170 }
  0xac   : > { %v1173_v36 = vpop.permute.xlu1 %1172 }
  0xad   : > { %2802 = vmatmul.mubr.msk.bf16.vlgmr.msra.gmra.mrb[16].mxu1 %vm337_vm3, %v2666_v29  ;;  %v1177_v46 = vsel %vm1176_vm9, %v1171_v34, %v1173_v36 }
  0xae   : > { %2806 = vmatpush3.bf16.msra.mxu1 %v939_v30  ;;  %2807 = vmatprep.mubr.msk.bf16.mxu1 %vm3022_vm0, %v3021_v3  ;;  %v1175_v40 = vpop.permute.xlu0 %1174  ;;  %v1183_v49 = vsel %vm341_vm1, %v1177_v46, 0 }
  0xaf   : > { %2811 = vmatprep.subr.bf16.mxu1 %v3021_v3  ;;  %v1178_v43 = vsel %vm1176_vm9, %v1173_v36, %v1175_v40  ;;  %v1189_v45 = vsel %vm341_vm1, %v1175_v40, 0  ;;  %vm2133_vm9 = vcmask 908288  }
  0xb0   : > { %2668 = vmatmul.mubr.msk.bf16.vlgmr.msra.gmra.mrb[16].mxu0 %vm337_vm3, %v2666_v29  ;;  %v1296_v42 = vpop.permute.xlu1 %1295 }
  0xb1   : > { %942 = vmatpush1.bf16.msra.mxu0 %v933_v33  ;;  %973 = vmatprep.mubr.bf16.mxu0 %v3023_v6 }
  0xb2   : > { %2675 = vmatprep.subr.msk.bf16.mxu0 %vm341_vm1, %v1053_v35  ;;  %v1298_v47 = vpop.permute.xlu0 %1297 }
  0xb3   : > { %v1302_v52 = vsel %vm1301_vm10, %v1296_v42, %v1298_v47 }
  0xb4   : > { %v1300_v48 = vpop.permute.xlu1 %1299  ;;  %v1308_v54 = vsel %vm341_vm1, %v1302_v52, 0 }
  0xb5   : > { %2808 = vmatmul.mubr.msk.bf16.vlgmr.msra.gmra.mrb[20].mxu1 %vm337_vm3, %v2670_v37  ;;  %v1303_v50 = vsel %vm1301_vm10, %v1298_v47, %v1300_v48  ;;  %v1314_v53 = vsel %vm341_vm1, %v1300_v48, 0 }
  0xb6   : > { %2812 = vmatpush3.bf16.msra.mxu1 %v1064_v39  ;;  %2813 = vmatprep.mubr.msk.bf16.mxu1 %vm3022_vm0, %v3021_v3 }
  0xb7   : > { %2817 = vmatprep.subr.bf16.mxu1 %v3021_v3 }
  0xb8   : > { %2672 = vmatmul.mubr.msk.bf16.vlgmr.msra.gmra.mrb[20].mxu0 %vm337_vm3, %v2670_v37 }
  0xb9   : > { %1067 = vmatpush1.bf16.msra.mxu0 %v1058_v41  ;;  %1098 = vmatprep.mubr.bf16.mxu0 %v3023_v6 }
  0xba   : > { %2679 = vmatprep.subr.msk.bf16.mxu0 %vm341_vm1, %v1178_v43 }
  0xbd   : > { %2814 = vmatmul.mubr.msk.bf16.vlgmr.msra.gmra.mrb[24].mxu1 %vm337_vm3, %v2674_v44 }
  0xbe   : > { %2818 = vmatpush3.bf16.msra.mxu1 %v1189_v45  ;;  %2819 = vmatprep.mubr.msk.bf16.mxu1 %vm3022_vm0, %v3021_v3 }
  0xbf   : > { %2823 = vmatprep.subr.bf16.mxu1 %v3021_v3 }
  0xc0   : > { %2676 = vmatmul.mubr.msk.bf16.vlgmr.msra.gmra.mrb[24].mxu0 %vm337_vm3, %v2674_v44 }
  0xc1   : > { %1192 = vmatpush1.bf16.msra.mxu0 %v1183_v49  ;;  %1223 = vmatprep.mubr.bf16.mxu0 %v3023_v6 }
  0xc2   : > { %2683 = vmatprep.subr.msk.bf16.mxu0 %vm341_vm1, %v1303_v50 }
  0xc5   : > { %2820 = vmatmul.mubr.msk.bf16.vlgmr.msra.gmra.mrb[28].mxu1 %vm337_vm3, %v2678_v51 }
  0xc6   : > { %2824 = vmatpush3.bf16.msra.mxu1 %v1314_v53  ;;  %2825 = vmatprep.mubr.msk.bf16.mxu1 %vm3022_vm0, %v3021_v3 }
  0xc7   : > { %2829 = vmatprep.subr.bf16.mxu1 %v3021_v3 }
  0xc8   : > { %2680 = vmatmul.mubr.msk.bf16.vlgmr.msra.gmra.mrb[28].mxu0 %vm337_vm3, %v2678_v51 }
  0xc9   : > { %1317 = vmatpush1.bf16.msra.mxu0 %v1308_v54  ;;  %1348 = vmatprep.mubr.bf16.mxu0 %v3023_v6 }
  0xcd   : > { %2826 = vmatmul.mubr.msk.bf16.vlgmr.msra.gmra.mrb[32].mxu1 %vm337_vm3, %v2682_v55 }
  0xce   : > { %2831 = vmatprep.mubr.msk.bf16.mxu1 %vm3022_vm0, %v3021_v3 }
  0xd0   : > { %2684 = vmatmul.mubr.msk.bf16.vlgmr.msra.gmra.mrb[32].mxu0 %vm337_vm3, %v2682_v55 }
  0xd1   : > { %1537 = vmatprep.mubr.bf16.mxu0 %v3023_v6 }
 0x160   : > { %v426_v56 = vpop.f32.mrb[0].mxu1 }
 0x161   : > { %v2779_v57 = vpop.f32.mrb[1].mxu1 }
 0x162   : > { %v429_v58 = vpop.f32.mrb[2].mxu1 }
 0x163   : > { %v385_v59 = vpop.f32.mrb[0].mxu0  ;;  %v2780_v60 = vpop.f32.mrb[3].mxu1 }
 0x164   : > { %v387_v61 = vpop.f32.mrb[1].mxu0 }
 0x165   : > { %v389_v62 = vpop.f32.mrb[2].mxu0 }
 0x166   : > { %v390_v63 = vpop.f32.mrb[3].mxu0 }
 0x168   : > { %v519_v0 = vpop.f32.mrb[4].mxu1 }
 0x169   : > { %v520_v1 = vadd.f32 %v519_v0, %v426_v56  ;;  %v2785_v2 = vpop.f32.mrb[5].mxu1 }
 0x16a   : > { %v522_v5 = vpop.f32.mrb[6].mxu1 }
 0x16b   : > { %v478_v8 = vpop.f32.mrb[4].mxu0  ;;  %v2786_v9 = vpop.f32.mrb[7].mxu1 }
 0x16c   : > { %v479_v10 = vadd.f32 %v478_v8, %v385_v59  ;;  %v480_v11 = vpop.f32.mrb[5].mxu0 }
 0x16d   : > { %v481_v12 = vadd.f32 %v480_v11, %v387_v61  ;;  %v482_v13 = vpop.f32.mrb[6].mxu0  ;;  %v1412_v11 = vld [vmem:[%s3459_s5] sm:$0x7] }
 0x16e   : > { %v483_v14 = vpop.f32.mrb[7].mxu0 }
 0x170   : > { %v641_v15 = vpop.f32.mrb[8].mxu1 }
 0x171   : > { %v649_v16 = vadd.f32 %v641_v15, %v520_v1  ;;  %v2791_v17 = vpop.f32.mrb[9].mxu1 }
 0x172   : > { %v644_v18 = vpop.f32.mrb[10].mxu1  ;;  %v1413_v17 = vunpack.c.l.bf16 %v1412_v11 }
 0x173   : > { %v600_v19 = vpop.f32.mrb[8].mxu0  ;;  %v2792_v20 = vpop.f32.mrb[11].mxu1  ;;  %v1425_v18 = vsub.s32 4, %v3093_v4 }
 0x174   : > { %v647_v21 = vadd.f32 %v600_v19, %v479_v10  ;;  %v602_v22 = vpop.f32.mrb[9].mxu0 }
 0x175   : > { %v648_v23 = vadd.f32 %v602_v22, %v481_v12  ;;  %v604_v24 = vpop.f32.mrb[10].mxu0 }
 0x176   : > { %v605_v25 = vpop.f32.mrb[11].mxu0  ;;  %v1417_v24 = vsub.s32 0, %v3093_v4 }
 0x177   : > { %v1426_v25 = vrot.slane %v1413_v17, %v1425_v18 }
 0x178   : > { %v766_v26 = vpop.f32.mrb[12].mxu1 }
 0x179   : > { %v774_v27 = vadd.f32 %v766_v26, %v649_v16  ;;  %v2797_v28 = vpop.f32.mrb[13].mxu1  ;;  %v1421_v26 = vsub.s32 2, %v3093_v4 }
 0x17a   : > { %v769_v29 = vpop.f32.mrb[14].mxu1  ;;  %v1404_v28 = vpop.permute.xlu0 %1403 }
 0x17b   : > { %v725_v30 = vpop.f32.mrb[12].mxu0  ;;  %v2798_v31 = vpop.f32.mrb[15].mxu1 }
 0x17c   : > { %v772_v32 = vadd.f32 %v725_v30, %v647_v21  ;;  %v727_v33 = vpop.f32.mrb[13].mxu0  ;;  %v1418_v31 = vrot.slane %v1413_v17, %v1417_v24 }
 0x17d   : > { %v773_v34 = vadd.f32 %v727_v33, %v648_v23  ;;  %v729_v35 = vpop.f32.mrb[14].mxu0  ;;  %v1441_v33 = vrot.slane %v1426_v25, %v1417_v24 }
 0x17e   : > { %v730_v36 = vpop.f32.mrb[15].mxu0 }
 0x17f   : > { %v1422_v36 = vrot.slane %v1413_v17, %v1421_v26 }
 0x180   : > { %v891_v37 = vpop.f32.mrb[16].mxu1 }
 0x181   : > { %v899_v38 = vadd.f32 %v891_v37, %v774_v27  ;;  %v2803_v39 = vpop.f32.mrb[17].mxu1 }
 0x182   : > { %v894_v40 = vpop.f32.mrb[18].mxu1 }
 0x183   : > { %v850_v41 = vpop.f32.mrb[16].mxu0  ;;  %v2804_v42 = vpop.f32.mrb[19].mxu1 }
 0x184   : > { %v897_v43 = vadd.f32 %v850_v41, %v772_v32  ;;  %v852_v44 = vpop.f32.mrb[17].mxu0 }
 0x185   : > { %v898_v45 = vadd.f32 %v852_v44, %v773_v34  ;;  %v854_v46 = vpop.f32.mrb[18].mxu0  ;;  %v1433_v44 = vrot.slane %v1418_v31, %v1417_v24 }
 0x186   : > { %v855_v47 = vpop.f32.mrb[19].mxu0 }
 0x187   : > { %v1437_v47 = vrot.slane %v1422_v36, %v1417_v24 }
 0x188   : > { %v1016_v48 = vpop.f32.mrb[20].mxu1 }
 0x189   : > { %v1024_v49 = vadd.f32 %v1016_v48, %v899_v38  ;;  %v2809_v50 = vpop.f32.mrb[21].mxu1 }
 0x18a   : > { %v1019_v51 = vpop.f32.mrb[22].mxu1 }
 0x18b   : > { %v975_v52 = vpop.f32.mrb[20].mxu0  ;;  %v2810_v53 = vpop.f32.mrb[23].mxu1 }
 0x18c   : > { %v1022_v54 = vadd.f32 %v975_v52, %v897_v43  ;;  %v977_v55 = vpop.f32.mrb[21].mxu0 }
 0x18d   : > { %v1023_v56 = vadd.f32 %v977_v55, %v898_v45  ;;  %v979_v57 = vpop.f32.mrb[22].mxu0 }
 0x18e   : > { %v980_v58 = vpop.f32.mrb[23].mxu0 }
 0x190   : > { %v1141_v59 = vpop.f32.mrb[24].mxu1 }
 0x191   : > { %v1149_v60 = vadd.f32 %v1141_v59, %v1024_v49  ;;  %v2815_v61 = vpop.f32.mrb[25].mxu1 }
 0x192   : > { %v1144_v62 = vpop.f32.mrb[26].mxu1 }
 0x193   : > { %v1100_v63 = vpop.f32.mrb[24].mxu0  ;;  %v2816_v0 = vpop.f32.mrb[27].mxu1 }
 0x194   : > { %v1147_v1 = vadd.f32 %v1100_v63, %v1022_v54  ;;  %v1102_v2 = vpop.f32.mrb[25].mxu0  ;;  %v2453_v63 = vld [vmem:[%s3108_s10] sm:$0x3f] }
 0x195   : > { %v1148_v5 = vadd.f32 %v1102_v2, %v1023_v56  ;;  %v1104_v8 = vpop.f32.mrb[26].mxu0  ;;  %v2469_v0 = vrot.slane %v2453_v63, %v3102_v7 }
 0x196   : > { %v1105_v9 = vpop.f32.mrb[27].mxu0  ;;  %v2455_v8 = vld [vmem:[%s3461_s7] sm:$0xff] }
 0x197   : > { %v2444_v9 = vld [vmem:[%s3458_s4] sm:$0xff] }
 0x198   : > { %v1266_v10 = vpop.f32.mrb[28].mxu1 }
 0x199   : > { %v1274_v12 = vadd.f32 %v1266_v10, %v1149_v60  ;;  %v2821_v13 = vpop.f32.mrb[29].mxu1 }
 0x19a   : > { %v1269_v14 = vpop.f32.mrb[30].mxu1 }
 0x19b   : > { %v1225_v15 = vpop.f32.mrb[28].mxu0  ;;  %v2822_v16 = vpop.f32.mrb[31].mxu1 }
 0x19c   : > { %v1272_v19 = vadd.f32 %v1225_v15, %v1147_v1  ;;  %v1227_v20 = vpop.f32.mrb[29].mxu0  ;;  %v2462_v1 = vcombine.high %v2453_v63, %v2453_v63  ;;  %v2688_v16 = vld [vmem:[%s3457_s3 + $0x4] sm:$0xf] }
 0x19d   : > { %v1273_v21 = vadd.f32 %v1227_v20, %v1148_v5  ;;  %v1229_v22 = vpop.f32.mrb[30].mxu0  ;;  %v2477_v5 = vcombine.high %v2469_v0, %v2469_v0 }
 0x19e   : > { %v1230_v23 = vpop.f32.mrb[31].mxu0  ;;  %v2476_v2 = vrot.slane %v2462_v1, %v3102_v7 }
 0x1a0   : > { %v1391_v27 = vpop.f32.mrb[32].mxu1 }
 0x1a1   : > { %v1399_v29 = vadd.f32 %v1391_v27, %v1274_v12  ;;  %v2827_v30 = vpop.f32.mrb[33].mxu1 }
 0x1a2   : > { %v1394_v32 = vpop.f32.mrb[34].mxu1  ;;  %v1466_v30 = vld [vmem:[%s3457_s3] sm:$0xf] }
 0x1a3   : > { %v1408_v34 = vadd.f32 %v1404_v28, %v1399_v29  ;;  %v1350_v35 = vpop.f32.mrb[32].mxu0  ;;  %v2828_v37 = vpop.f32.mrb[35].mxu1 }
 0x1a4   : > { %v1397_v38 = vadd.f32 %v1350_v35, %v1272_v19  ;;  %v1352_v39 = vpop.f32.mrb[33].mxu0 }
 0x1a5   : > { %v1411_v40 = vmax.f32 %v1408_v34, 0.0  ;;  %v1398_v41 = vadd.f32 %v1352_v39, %v1273_v21  ;;  %v1354_v42 = vpop.f32.mrb[34].mxu0 }
 0x1a6   : > { %v1406_v43 = vadd.f32 %v1404_v28, %v1397_v38  ;;  %v1355_v45 = vpop.f32.mrb[35].mxu0 }
 0x1a7   : > { %v1444_v4 = vmul.f32 %v1441_v33, %v1411_v40  ;;  %v1407_v46 = vadd.f32 %v1404_v28, %v1398_v41 }
 0x1a8   : > { %v1409_v48 = vmax.f32 %v1406_v43, 0.0  ;;  %v2699_v43 = vld [vmem:[%s3457_s3 + $0x8] sm:$0xf] }
 0x1a9   : > { %v2736_v49 = vpack.c.bf16 %v1444_v4, %v1444_v4  ;;  %v1410_v50 = vmax.f32 %v1407_v46, 0.0 }
 0x1aa   : > { %v1442_v51 = vmul.f32 %v1433_v44, %v1409_v48  ;;  %v2703_v48 = vld [vmem:[%s3457_s3 + $0xc] sm:$0xf] }
 0x1ab   : > { %1463 = vst.msk [vmem:[#allocation2 + $0xc] sm:$0xf] %vm1462_vm12, %v2736_v49  ;;  %v1443_v52 = vmul.f32 %v1437_v47, %v1410_v50 }
 0x1ac   : > { %v3281_v60 = vpack.c.bf16 %v1442_v51, %v1442_v51 }
 0x1ad   : > { %v2735_v53 = vpack.c.bf16 %v1443_v52, %v1442_v51  ;;  %v3289_v62 = vpack.c.bf16 %v1443_v52, %v1443_v52 }
 0x1ae   : > { %v1927_v51 = vsel %vm1495_vm14, %v3281_v60, 0 }
 0x1af   : > { %1461 = vst [vmem:[#allocation2 + $0x4] sm:$0xff] %v2735_v53 }
 0x1b2   : > { %v3285_v61 = vld [vmem:[#allocation2 + $0xc] ss:$0 sps:$4 sm:$0xff]  }
 0x1b6   : > { %v1464_v54 = vld [vmem:[#allocation2] sm:$0xff]  ;;  %v1465_v55 = vld [vmem:[#allocation2 + $0x8] sm:$0xff] }
 0x1b7   : > { %v2689_v56 = vcombine.low %v1464_v54, %v1464_v54  ;;  %v2691_v57 = vcombine.low %v1465_v55, %v1465_v55  ;;  %v2690_v58 = vcombine.high %v1464_v54, %v1464_v54  ;;  %v2692_v59 = vcombine.high %v1465_v55, %v1465_v55 }
 0x1b8   : > { %v1933_v54 = vsel %vm1495_vm14, %v3285_v61, 0 }
 0x1b9   : > { %1479 = vrot.lane.b32.xlu1 %v2689_v56, %s3032_s25  ;;  %1483 = vrot.lane.b32.xlu0 %v2691_v57, %s3032_s25 }
 0x1bd   : > { %1481 = vrot.lane.b32.xlu1 %v2690_v58, %s3032_s25  ;;  %1586 = vrot.lane.b32.xlu0 %v2689_v56, %s3033_s26 }
 0x1c1   : > { %1485 = vrot.lane.b32.xlu1 %v2692_v59, %s3032_s25  ;;  %1590 = vrot.lane.b32.xlu0 %v2691_v57, %s3033_s26 }
 0x1c5   : > { %1588 = vrot.lane.b32.xlu1 %v2690_v58, %s3033_s26  ;;  %1693 = vrot.lane.b32.xlu0 %v2689_v56, %s3034_s29 }
 0x1c9   : > { %1592 = vrot.lane.b32.xlu1 %v2692_v59, %s3033_s26  ;;  %1697 = vrot.lane.b32.xlu0 %v2691_v57, %s3034_s29 }
 0x1cd   : > { %1695 = vrot.lane.b32.xlu1 %v2690_v58, %s3034_s29  ;;  %1803 = vrot.lane.b32.xlu0 %v2689_v56, %s3035_s30  ;;  %v2707_v56 = vld [vmem:[%s3457_s3 + $0x10] sm:$0xf] }
 0x1d1   : > { %1699 = vrot.lane.b32.xlu1 %v2692_v59, %s3034_s29  ;;  %1807 = vrot.lane.b32.xlu0 %v2691_v57, %s3035_s30 }
 0x1d5   : > { %1805 = vrot.lane.b32.xlu1 %v2690_v58, %s3035_s30  ;;  %2021 = vrot.lane.b32.xlu0 %v3281_v60, %s3024_s11 }
 0x1d9   : > { %1809 = vrot.lane.b32.xlu1 %v2692_v59, %s3035_s30  ;;  %2025 = vrot.lane.b32.xlu0 %v3285_v61, %s3024_s11 }
 0x1dd   : > { %2023 = vrot.lane.b32.xlu1 %v3289_v62, %s3024_s11  ;;  %2129 = vrot.lane.b32.xlu0 %v3289_v62, %s3036_s9 }
 0x1e1   : > { %2127 = vrot.lane.b32.xlu1 %v3281_v60, %s3036_s9  ;;  %2234 = vrot.lane.b32.xlu0 %v3281_v60, %s3026_s13 }
 0x1e5   : > { %2131 = vrot.lane.b32.xlu1 %v3285_v61, %s3036_s9  ;;  %2238 = vrot.lane.b32.xlu0 %v3285_v61, %s3026_s13 }
 0x1e9   : > { %2236 = vrot.lane.b32.xlu1 %v3289_v62, %s3026_s13  ;;  %2342 = vrot.lane.b32.xlu0 %v3289_v62, %s3027_s14 }
 0x1ed   : > { %2340 = vrot.lane.b32.xlu1 %v3281_v60, %s3027_s14  ;;  %2478 = vrot.lane.b32.xlu0 %v2469_v0, %s3027_s14  ;;  %v2714_v0 = vld [vmem:[%s3457_s3 + $0x14] sm:$0xf] }
 0x1f1   : > { %2344 = vrot.lane.b32.xlu1 %v3285_v61, %s3027_s14  ;;  %2482 = vrot.lane.b32.xlu0 %v2476_v2, %s3027_s14 }
 0x1f5   : > { %2480 = vrot.lane.b32.xlu1 %v2477_v5, %s3027_s14  ;;  %2458 = vperm.xlu0 %2994, %v2455_v8   ;;  %s2968_s14 = smul.u32 24, %s3464_s28 }
 0x1f7   : > { %s305_s17 = scalar_lea.vmem %s3462_s8, %s2968_s14 }
 0x1f9   : > { %2447 = vperm.xlu1 %2995, %v2444_v9  }
 0x22b   : > { %v1480_v10 = vpop.permute.xlu1 %1479  ;;  %v1484_v7 = vpop.permute.xlu0 %1483 }
 0x22f   : > { %v1482_v11 = vpop.permute.xlu1 %1481  ;;  %v1587_v12 = vpop.permute.xlu0 %1586 }
 0x230   : > { %v1488_v13 = vsel %vm1487_vm13, %v1480_v10, %v1482_v11  ;;  %v1489_v14 = vsel %vm1487_vm13, %v1482_v11, %v1484_v7  ;;  %v2718_v11 = vld [vmem:[%s3457_s3 + $0x18] sm:$0xf] }
 0x231   : > { %v1497_v15 = vsel %vm1495_vm14, %v1488_v13, 0  ;;  %2693 = vmatprep.subr.msk.bf16.mxu0 %vm1495_vm14, %v1489_v14 }
 0x232   : > { %1506 = vmatpush1.bf16.msra.mxu0 %v1497_v15 }
 0x233   : > { %v1486_v17 = vpop.permute.xlu1 %1485  ;;  %v1591_v18 = vpop.permute.xlu0 %1590 }
 0x234   : > { %v1490_v19 = vsel %vm1487_vm13, %v1484_v7, %v1486_v17 }
 0x235   : > { %v1503_v20 = vsel %vm1495_vm14, %v1490_v19, 0  ;;  %2694 = vmatmul.mubr.msk.bf16.vlgmr.msra.gmra.mrb[36].mxu0 %vm1491_vm15, %v2688_v16  ;;  %v2722_v19 = vld [vmem:[%s3457_s3 + $0x1c] sm:$0xf] }
 0x236   : > { %2830 = vmatpush3.bf16.msra.mxu1 %v1503_v20  ;;  %1642 = vmatprep.mubr.bf16.mxu0 %v3023_v6 }
 0x237   : > { %v1589_v21 = vpop.permute.xlu1 %1588  ;;  %v1694_v22 = vpop.permute.xlu0 %1693  ;;  %2835 = vmatprep.subr.bf16.mxu1 %v3021_v3 }
 0x238   : > { %v1595_v23 = vsel %vm1594_vm4, %v1587_v12, %v1589_v21  ;;  %v1596_v24 = vsel %vm1594_vm4, %v1589_v21, %v1591_v18 }
 0x239   : > { %v1602_v25 = vsel %vm1495_vm14, %v1595_v23, 0  ;;  %2832 = vmatmul.mubr.msk.bf16.vlgmr.msra.gmra.mrb[36].mxu1 %vm1491_vm15, %v2688_v16  ;;  %2696 = vmatprep.subr.msk.bf16.mxu0 %vm1495_vm14, %v1596_v24 }
 0x23a   : > { %1611 = vmatpush1.bf16.msra.mxu0 %v1602_v25  ;;  %2837 = vmatprep.mubr.msk.bf16.mxu1 %vm3022_vm0, %v3021_v3 }
 0x23b   : > { %v1593_v26 = vpop.permute.xlu1 %1592  ;;  %v1698_v27 = vpop.permute.xlu0 %1697 }
 0x23c   : > { %v1597_v28 = vsel %vm1594_vm4, %v1591_v18, %v1593_v26  ;;  %v2726_v26 = vld [vmem:[%s3457_s3 + $0x20] sm:$0xf] }
 0x23d   : > { %v1608_v29 = vsel %vm1495_vm14, %v1597_v28, 0 }
 0x23e   : > { %2836 = vmatpush3.bf16.msra.mxu1 %v1608_v29  ;;  %v2454_v29 = vld [vmem:[%s3460_s6] sm:$0xf] }
 0x23f   : > { %v1696_v31 = vpop.permute.xlu1 %1695  ;;  %2841 = vmatprep.subr.bf16.mxu1 %v3021_v3  ;;  %v1804_v35 = vpop.permute.xlu0 %1803 }
 0x240   : > { %v1702_v32 = vsel %vm1701_vm7, %v1694_v22, %v1696_v31  ;;  %v1703_v33 = vsel %vm1701_vm7, %v1696_v31, %v1698_v27 }
 0x241   : > { %v1709_v34 = vsel %vm1495_vm14, %v1702_v32, 0  ;;  %2697 = vmatmul.mubr.msk.bf16.vlgmr.msra.gmra.mrb[36].mxu0 %vm1491_vm15, %v1466_v30  ;;  %2700 = vmatprep.subr.msk.bf16.mxu0 %vm1495_vm14, %v1703_v33 }
 0x242   : > { %1718 = vmatpush1.bf16.msra.mxu0 %v1709_v34  ;;  %1749 = vmatprep.mubr.bf16.mxu0 %v3023_v6 }
 0x243   : > { %v1700_v36 = vpop.permute.xlu1 %1699  ;;  %v1808_v39 = vpop.permute.xlu0 %1807 }
 0x244   : > { %v1704_v37 = vsel %vm1701_vm7, %v1698_v27, %v1700_v36 }
 0x245   : > { %v1715_v38 = vsel %vm1495_vm14, %v1704_v37, 0  ;;  %2838 = vmatmul.mubr.msk.bf16.vlgmr.msra.gmra.mrb[36].mxu1 %vm1491_vm15, %v1466_v30 }
 0x246   : > { %2842 = vmatpush3.bf16.msra.mxu1 %v1715_v38  ;;  %2843 = vmatprep.mubr.msk.bf16.mxu1 %vm3022_vm0, %v3021_v3 }
 0x247   : > { %v1806_v40 = vpop.permute.xlu1 %1805  ;;  %2847 = vmatprep.subr.bf16.mxu1 %v3021_v3  ;;  %v2022_v47 = vpop.permute.xlu0 %2021 }
 0x248   : > { %v1813_v41 = vsel %vm1811_vm8, %v1806_v40, %v1808_v39  ;;  %v1812_v42 = vsel %vm1811_vm8, %v1804_v35, %v1806_v40 }
 0x249   : > { %2704 = vmatprep.subr.msk.bf16.mxu0 %vm1495_vm14, %v1813_v41  ;;  %v1819_v45 = vsel %vm1495_vm14, %v1812_v42, 0 }
 0x24b   : > { %v1810_v44 = vpop.permute.xlu1 %1809  ;;  %v2026_v50 = vpop.permute.xlu0 %2025 }
 0x24c   : > { %v1814_v4 = vsel %vm1811_vm8, %v1808_v39, %v1810_v44  ;;  %v2039_v61 = vsel %vm1495_vm14, %v2026_v50, 0 }
 0x24d   : > { %2701 = vmatmul.mubr.msk.bf16.vlgmr.msra.gmra.mrb[36].mxu0 %vm1491_vm15, %v2699_v43  ;;  %v1825_v46 = vsel %vm1495_vm14, %v1814_v4, 0 }
 0x24e   : > { %1828 = vmatpush1.bf16.msra.mxu0 %v1819_v45  ;;  %1859 = vmatprep.mubr.bf16.mxu0 %v3023_v6 }
 0x24f   : > { %2711 = vmatprep.subr.msk.bf16.mxu0 %vm1495_vm14, %v3289_v62  ;;  %v2024_v49 = vpop.permute.xlu1 %2023  ;;  %v2130_v59 = vpop.permute.xlu0 %2129 }
 0x250   : > { %v2028_v52 = vsel %vm334_vm2, %v2024_v49, %v2026_v50  ;;  %v2027_v55 = vsel %vm334_vm2, %v2022_v47, %v2024_v49 }
 0x251   : > { %2844 = vmatmul.mubr.msk.bf16.vlgmr.msra.gmra.mrb[36].mxu1 %vm1491_vm15, %v2699_v43  ;;  %v2033_v58 = vsel %vm1495_vm14, %v2027_v55, 0 }
 0x252   : > { %2848 = vmatpush3.bf16.msra.mxu1 %v1825_v46  ;;  %2849 = vmatprep.mubr.msk.bf16.mxu1 %vm3022_vm0, %v3021_v3 }
 0x253   : > { %2853 = vmatprep.subr.bf16.mxu1 %v3021_v3  ;;  %v2128_v53 = vpop.permute.xlu1 %2127  ;;  %v2235_v62 = vpop.permute.xlu0 %2234 }
 0x254   : > { %v2134_v63 = vsel %vm2133_vm9, %v2128_v53, %v2130_v59 }
 0x255   : > { %v2140_v2 = vsel %vm1495_vm14, %v2134_v63, 0 }
 0x257   : > { %v2132_v57 = vpop.permute.xlu1 %2131  ;;  %v2239_v5 = vpop.permute.xlu0 %2238 }
 0x258   : > { %v2135_v60 = vsel %vm2133_vm9, %v2130_v59, %v2132_v57  ;;  %v2146_v9 = vsel %vm1495_vm14, %v2132_v57, 0  ;;  %v2252_v16 = vsel %vm1495_vm14, %v2239_v5, 0 }
 0x259   : > { %2705 = vmatmul.mubr.msk.bf16.vlgmr.msra.gmra.mrb[36].mxu0 %vm1491_vm15, %v2703_v48 }
 0x25a   : > { %1936 = vmatpush1.bf16.msra.mxu0 %v1927_v51  ;;  %1967 = vmatprep.mubr.bf16.mxu0 %v3023_v6 }
 0x25b   : > { %2715 = vmatprep.subr.msk.bf16.mxu0 %vm1495_vm14, %v2028_v52  ;;  %v2237_v1 = vpop.permute.xlu1 %2236  ;;  %v2343_v14 = vpop.permute.xlu0 %2342 }
 0x25c   : > { %v2241_v8 = vsel %vm676_vm5, %v2237_v1, %v2239_v5  ;;  %v2240_v7 = vsel %vm676_vm5, %v2235_v62, %v2237_v1 }
 0x25d   : > { %2850 = vmatmul.mubr.msk.bf16.vlgmr.msra.gmra.mrb[36].mxu1 %vm1491_vm15, %v2703_v48  ;;  %v2246_v13 = vsel %vm1495_vm14, %v2240_v7, 0 }
 0x25e   : > { %2854 = vmatpush3.bf16.msra.mxu1 %v1933_v54  ;;  %2855 = vmatprep.mubr.msk.bf16.mxu1 %vm3022_vm0, %v3021_v3 }
 0x25f   : > { %2859 = vmatprep.subr.bf16.mxu1 %v3021_v3  ;;  %v2341_v10 = vpop.permute.xlu1 %2340  ;;  %v2479_v17 = vpop.permute.xlu0 %2478 }
 0x260   : > { %v2346_v18 = vsel %vm801_vm6, %v2341_v10, %v2343_v14 }
 0x261   : > { %v2352_v23 = vsel %vm1495_vm14, %v2346_v18, 0 }
 0x263   : > { %v2345_v12 = vpop.permute.xlu1 %2344  ;;  %v2483_v20 = vpop.permute.xlu0 %2482 }
 0x264   : > { %v2347_v15 = vsel %vm801_vm6, %v2343_v14, %v2345_v12  ;;  %v2358_v24 = vsel %vm1495_vm14, %v2345_v12, 0  ;;  %v2496_v28 = vsel %vm341_vm1, %v2483_v20, 0 }
 0x265   : > { %2712 = vmatmul.mubr.msk.bf16.vlgmr.msra.gmra.mrb[36].mxu0 %vm1491_vm15, %v2707_v56 }
 0x266   : > { %2042 = vmatpush1.bf16.msra.mxu0 %v2033_v58  ;;  %2073 = vmatprep.mubr.bf16.mxu0 %v3023_v6 }
 0x267   : > { %2719 = vmatprep.subr.msk.bf16.mxu0 %vm1495_vm14, %v2135_v60  ;;  %v2481_v21 = vpop.permute.xlu1 %2480 }
 0x268   : > { %v2485_v22 = vsel %vm801_vm6, %v2481_v21, %v2483_v20  ;;  %v2484_v25 = vsel %vm801_vm6, %v2479_v17, %v2481_v21 }
 0x269   : > { %2856 = vmatmul.mubr.msk.bf16.vlgmr.msra.gmra.mrb[36].mxu1 %vm1491_vm15, %v2707_v56  ;;  %v2490_v27 = vsel %vm341_vm1, %v2484_v25, 0 }
 0x26a   : > { %2860 = vmatpush3.bf16.msra.mxu1 %v2039_v61  ;;  %2861 = vmatprep.mubr.msk.bf16.mxu1 %vm3022_vm0, %v3021_v3 }
 0x26b   : > { %2865 = vmatprep.subr.bf16.mxu1 %v3021_v3 }
 0x271   : > { %2716 = vmatmul.mubr.msk.bf16.vlgmr.msra.gmra.mrb[36].mxu0 %vm1491_vm15, %v2714_v0 }
 0x272   : > { %2149 = vmatpush1.bf16.msra.mxu0 %v2140_v2  ;;  %2180 = vmatprep.mubr.bf16.mxu0 %v3023_v6 }
 0x273   : > { %2723 = vmatprep.subr.msk.bf16.mxu0 %vm1495_vm14, %v2241_v8 }
 0x274   : > { %v2459_v31 = vpop.permute.xlu0 %2458 }
 0x275   : > { %2862 = vmatmul.mubr.msk.bf16.vlgmr.msra.gmra.mrb[36].mxu1 %vm1491_vm15, %v2714_v0 }
 0x276   : > { %2866 = vmatpush3.bf16.msra.mxu1 %v2146_v9  ;;  %2867 = vmatprep.mubr.msk.bf16.mxu1 %vm3022_vm0, %v3021_v3 }
 0x277   : > { %2871 = vmatprep.subr.bf16.mxu1 %v3021_v3 }
 0x278   : > { %v2448_v30 = vpop.permute.xlu1 %2447 }
 0x27d   : > { %2720 = vmatmul.mubr.msk.bf16.vlgmr.msra.gmra.mrb[36].mxu0 %vm1491_vm15, %v2718_v11 }
 0x27e   : > { %2255 = vmatpush1.bf16.msra.mxu0 %v2246_v13  ;;  %2286 = vmatprep.mubr.bf16.mxu0 %v3023_v6 }
 0x27f   : > { %2727 = vmatprep.subr.msk.bf16.mxu0 %vm1495_vm14, %v2347_v15 }
 0x281   : > { %2868 = vmatmul.mubr.msk.bf16.vlgmr.msra.gmra.mrb[36].mxu1 %vm1491_vm15, %v2718_v11 }
 0x282   : > { %2872 = vmatpush3.bf16.msra.mxu1 %v2252_v16  ;;  %2873 = vmatprep.mubr.msk.bf16.mxu1 %vm3022_vm0, %v3021_v3 }
 0x283   : > { %2877 = vmatprep.subr.bf16.mxu1 %v3021_v3 }
 0x289   : > { %2724 = vmatmul.mubr.msk.bf16.vlgmr.msra.gmra.mrb[36].mxu0 %vm1491_vm15, %v2722_v19 }
 0x28a   : > { %2361 = vmatpush1.bf16.msra.mxu0 %v2352_v23  ;;  %2392 = vmatprep.mubr.bf16.mxu0 %v3023_v6 }
 0x28b   : > { %2730 = vmatprep.subr.msk.bf16.mxu0 %vm341_vm1, %v2485_v22 }
 0x28d   : > { %2874 = vmatmul.mubr.msk.bf16.vlgmr.msra.gmra.mrb[36].mxu1 %vm1491_vm15, %v2722_v19 }
 0x28e   : > { %2878 = vmatpush3.bf16.msra.mxu1 %v2358_v24  ;;  %2879 = vmatprep.mubr.msk.bf16.mxu1 %vm3022_vm0, %v3021_v3 }
 0x28f   : > { %2883 = vmatprep.subr.bf16.mxu1 %v3021_v3 }
 0x295   : > { %2728 = vmatmul.mubr.msk.bf16.vlgmr.msra.gmra.mrb[36].mxu0 %vm1491_vm15, %v2726_v26 }
 0x296   : > { %2499 = vmatpush1.bf16.msra.mxu0 %v2490_v27  ;;  %2530 = vmatprep.mubr.bf16.mxu0 %v3023_v6  ;;  %v2889_v6 = vadd.f32 %v2459_v31, %v2448_v30 }
 0x299   : > { %2880 = vmatmul.mubr.msk.bf16.vlgmr.msra.gmra.mrb[36].mxu1 %vm1491_vm15, %v2726_v26 }
 0x29a   : > { %2884 = vmatpush3.bf16.msra.mxu1 %v2496_v28  ;;  %2885 = vmatprep.mubr.msk.bf16.mxu1 %vm3022_vm0, %v3021_v3  ;;  %vm2587_vm0 = vcmask 261120  }
 0x2a1   : > { %2731 = vmatmul.mubr.msk.bf16.vlgmr.msra.gmra.mrb[36].mxu0 %vm337_vm3, %v2454_v29 }
 0x2a5   : > { %2886 = vmatmul.mubr.msk.bf16.vlgmr.msra.gmra.mrb[36].mxu1 %vm337_vm3, %v2454_v29 }
 0x374   : > { %v2532_v32 = vpop.f32.mrb[36].mxu0 }
 0x375   : > { %v2890_v33 = vadd.f32 %v2889_v6, %v2532_v32  ;;  %v2534_v34 = vpop.f32.mrb[37].mxu0 }
 0x376   : > { %v2892_v3 = vadd.f32 %v2889_v6, %v2534_v34  ;;  %v2536_v35 = vpop.f32.mrb[38].mxu0 }
 0x377   : > { %v2582_v36 = vmax.f32 %v2890_v33, 0.0  ;;  %v2537_v37 = vpop.f32.mrb[39].mxu0 }
 0x378   : > { %v2583_v38 = vmax.f32 %v2892_v3, 0.0  ;;  %v2573_v39 = vpop.f32.mrb[36].mxu1 }
 0x379   : > { %2585 = vst [vmem:[%s305_s17] sm:$0xff] %v2582_v36  ;;  %v2894_v40 = vadd.f32 %v2889_v6, %v2573_v39  ;;  %v2887_v41 = vpop.f32.mrb[37].mxu1 }
 0x37a   : > { %2586 = vst [vmem:[%s305_s17 + $0x8] sm:$0xff] %v2583_v38  ;;  %v2576_v42 = vpop.f32.mrb[38].mxu1 }
 0x37b   : > { %v2584_v43 = vmax.f32 %v2894_v40, 0.0  ;;  %v2888_v44 = vpop.f32.mrb[39].mxu1 }
 0x37d   : > { %2588 = vst.msk [vmem:[%s305_s17 + $0x10] sm:$0xff] %vm2587_vm0, %v2584_v43 }
 0x37e PF: > { %s18_s27 = sadd.s32 1, %s3018_s27  }
 0x37f   : > { %p15_p4 = scmp.ge.s32.totalorder %s18_s27, 4  }
 0x381   :  { %17 = sbr.rel (!%p15_p4) target bundleno = 1 (0x1), region = 98 }

</bundles_post_ra>
